<compile_context>
chip_gen: v6e
topology: v6e:2x2x1
jax: 0.10.0
libtpu: 0.0.40
codegen_flags: <defaults>
</compile_context>

<pallas_src>
import jax
import jax.numpy as jnp
from jax.experimental import pallas as pl
from jax.experimental.pallas import tpu as pltpu

H1 = 256
H2 = 512


def _round_up(x, m):
    return ((x + m - 1) // m) * m


def _mlp_kernel(z_ref, w1_ref, b1_ref, w2_ref, b2_ref, w3_ref, b3_ref, out_ref):
    # One batch tile (TB rows) per grid step; all three layers fused.
    # bf16 matmul operands, f32 accumulation; ReLU / bias-add in f32 (VPU).
    x = z_ref[...].astype(jnp.bfloat16)

    h1 = jnp.dot(x, w1_ref[...], preferred_element_type=jnp.float32) + b1_ref[...]
    h1 = jnp.maximum(h1, 0.0)

    h2 = jnp.dot(h1.astype(jnp.bfloat16), w2_ref[...],
                 preferred_element_type=jnp.float32) + b2_ref[...]
    h2 = jnp.maximum(h2, 0.0)

    y = jnp.dot(h2.astype(jnp.bfloat16), w3_ref[...],
                preferred_element_type=jnp.float32) + b3_ref[...]
    # tanh in the output dtype: bf16 on v6e/v7x doubles EUP throughput and
    # the bf16 store halves HBM writeback. Pad columns are tanh(0) = 0.
    out_ref[...] = jnp.tanh(y.astype(out_ref.dtype))


def _build_call(*, TB, z_dim_p, out_feat_p, grid, out_dtype, weight_mode,
                vmem_limit_bytes, cost):
    const = lambda i: (0, 0)  # same block every step -> stays VMEM-resident
    wkw = {} if weight_mode is None else {"pipeline_mode": weight_mode}
    in_specs = [
        pl.BlockSpec((TB, z_dim_p), lambda i: (i, 0)),          # z tile
        pl.BlockSpec((z_dim_p, H1), const, **wkw),              # w1
        pl.BlockSpec((1, H1), const, **wkw),                    # b1
        pl.BlockSpec((H1, H2), const, **wkw),                   # w2
        pl.BlockSpec((1, H2), const, **wkw),                    # b2
        pl.BlockSpec((H2, out_feat_p), const, **wkw),           # w3
        pl.BlockSpec((1, out_feat_p), const, **wkw),            # b3
    ]
    out_specs = pl.BlockSpec((TB, out_feat_p), lambda i: (i, 0))
    return pl.pallas_call(
        _mlp_kernel,
        out_shape=jax.ShapeDtypeStruct((grid[0] * TB, out_feat_p), out_dtype),
        grid=grid,
        in_specs=in_specs,
        out_specs=out_specs,
        compiler_params=pltpu.CompilerParams(
            dimension_semantics=("parallel",),
            vmem_limit_bytes=vmem_limit_bytes,
        ),
        cost_estimate=cost,
    )


def generator_modelnet_forward(z, params, num_points, *, batch_tile=256,
                               out_dtype=jnp.bfloat16):
    """z: (B, z_dim) float32 -> (B, num_points, 3) `out_dtype`.

    out_dtype defaults to bf16 (writeback-bound on v6e otherwise); pass
    jnp.float32 for dtype parity with the PyTorch module (and on v5e).
    """
    w1, b1, w2, b2, w3, b3 = params
    B, z_dim = z.shape
    out_feat = num_points * 3

    # ---- lane-dense K for layer 1: pad z_dim up to a multiple of 128 ----
    z_dim_p = _round_up(z_dim, 128)
    if z_dim_p != z_dim:
        z = jnp.pad(z, ((0, 0), (0, z_dim_p - z_dim)))
        w1 = jnp.pad(w1, ((0, z_dim_p - z_dim), (0, 0)))

    # ---- lane-dense output: pad final feature dim to a multiple of 128 ----
    out_feat_p = _round_up(out_feat, 128)
    if out_feat_p != out_feat:
        w3 = jnp.pad(w3, ((0, 0), (0, out_feat_p - out_feat)))
        b3 = jnp.pad(b3, ((0, 0), (0, out_feat_p - out_feat)))
        # tanh(0) = 0 in the pad columns; sliced off below.

    # ---- bf16 matmul operands (weights); biases stay f32 ----
    w1b = w1.astype(jnp.bfloat16)
    w2b = w2.astype(jnp.bfloat16)
    w3b = w3.astype(jnp.bfloat16)

    # ---- batch tiling: TB always a multiple of 8; >= 2 grid steps when the
    # batch allows so the "parallel" axis shards across both TCs on v7x ----
    B8 = _round_up(B, 8)
    TB = min(_round_up(batch_tile, 8), B8)
    if B8 >= 16 and pl.cdiv(B8, TB) < 2:
        TB = _round_up(pl.cdiv(B8, 2), 8)
    B_p = _round_up(B, TB)
    if B_p != B:
        z = jnp.pad(z, ((0, B_p - B), (0, 0)))
    grid = (B_p // TB,)

    # ---- explicit VMEM budget (re-derived for v7x's 64 MiB parts) ----
    out_isize = jnp.dtype(out_dtype).itemsize
    weight_bytes = (z_dim_p * H1 + H1 * H2 + H2 * out_feat_p) * 2 \
        + (H1 + H2 + out_feat_p) * 4
    io_bytes = 2 * TB * z_dim_p * 4 + 2 * TB * out_feat_p * out_isize
    interm_bytes = TB * (H1 + H2 + out_feat_p) * 4
    vmem_est = 2 * weight_bytes + io_bytes + interm_bytes
    vmem_limit_bytes = min(int(1.5 * vmem_est) + (8 << 20), 64 << 20)
    # TODO(synk): for num_points >= 2048 or batch_tile >= 512, split out_feat_p
    # over a second "arbitrary" grid axis (persisting h2 in a VMEM scratch) so
    # the w3 / output blocks stay within v7x's 64 MiB VMEM.

    cost = pl.CostEstimate(
        flops=2 * B_p * (z_dim_p * H1 + H1 * H2 + H2 * out_feat_p),
        transcendentals=B_p * out_feat_p,
        bytes_accessed=B_p * z_dim_p * 4 + weight_bytes
        + B_p * out_feat_p * out_isize,
    )

    args = (z, w1b, b1, w2b, b2, w3b, b3)
    kwargs = dict(TB=TB, z_dim_p=z_dim_p, out_feat_p=out_feat_p, grid=grid,
                  out_dtype=out_dtype, vmem_limit_bytes=vmem_limit_bytes,
                  cost=cost)
    try:
        # Grid-invariant weights/biases are DMA'd exactly once -> drop the
        # wasted second pipeline buffer (saves ~3+ MiB at num_points=1024).
        y_flat = _build_call(weight_mode=pl.Buffered(1), **kwargs)(*args)
    except Exception:
        # Fallback for JAX versions without BlockSpec(pipeline_mode=...).
        y_flat = _build_call(weight_mode=None, **kwargs)(*args)

    # Layout-only glue: strip padding, reshape to (B, num_points, 3).
    # TODO(synk): when out_feat is not a multiple of 128 this slice costs an
    # extra HBM pass over the dominant output traffic; consumers that accept
    # the padded (B_p, out_feat_p) buffer should slice lazily instead.
    return y_flat[:B, :out_feat].reshape(B, num_points, 3)


def init_params(key, z_dim, num_points):
    """Deterministic synthetic parameters (shapes match the nn.Linear layers)."""
    out_feat = num_points * 3
    ks = jax.random.split(key, 6)
    scale = 0.05
    w1 = scale * jax.random.normal(ks[0], (z_dim, H1), jnp.float32)
    b1 = scale * jax.random.normal(ks[1], (1, H1), jnp.float32)
    w2 = scale * jax.random.normal(ks[2], (H1, H2), jnp.float32)
    b2 = scale * jax.random.normal(ks[3], (1, H2), jnp.float32)
    w3 = scale * jax.random.normal(ks[4], (H2, out_feat), jnp.float32)
    b3 = scale * jax.random.normal(ks[5], (1, out_feat), jnp.float32)
    return (w1, b1, w2, b2, w3, b3)


def _reference_forward(z, params, num_points):
    # Full-precision f32 reference (kernel uses bf16 matmul operands, so the
    # comparison tolerance below is loosened accordingly).
    w1, b1, w2, b2, w3, b3 = params
    h1 = jnp.maximum(z @ w1 + b1, 0.0)
    h2 = jnp.maximum(h1 @ w2 + b2, 0.0)
    y = jnp.tanh(h2 @ w3 + b3)
    return y.reshape(-1, num_points, 3)


if __name__ == "__main__":
    B = 2
    Z_DIM = 32
    NUM_POINTS = 64  # small test size; PyTorch default would be 1024

    key = jax.random.PRNGKey(0)
    k_z, k_p = jax.random.split(key)
    z = jax.random.normal(k_z, (B, Z_DIM), jnp.float32)
    params = init_params(k_p, Z_DIM, NUM_POINTS)

    ref = _reference_forward(z, params, NUM_POINTS)

    # Default perf path: bf16 output (tanh range [-1,1] -> bf16 is safe).
    out_bf16 = jax.block_until_ready(
        generator_modelnet_forward(z, params, NUM_POINTS))
    assert out_bf16.shape == (B, NUM_POINTS, 3), out_bf16.shape
    assert out_bf16.dtype == jnp.bfloat16, out_bf16.dtype
    err = float(jnp.max(jnp.abs(out_bf16.astype(jnp.float32) - ref)))
    assert err < 2e-2, err

    # Exact-dtype parity path with the PyTorch module (f32 output).
    out_f32 = jax.block_until_ready(
        generator_modelnet_forward(z, params, NUM_POINTS,
                                   out_dtype=jnp.float32))
    assert out_f32.shape == (B, NUM_POINTS, 3), out_f32.shape
    assert out_f32.dtype == jnp.float32, out_f32.dtype
    err32 = float(jnp.max(jnp.abs(out_f32 - ref)))
    assert err32 < 2e-2, err32

    print("KERNEL_OK")
</pallas_src>

<mosaic_0001>
module attributes {stable_mosaic.version = 11 : i64} {
  func.func @_mlp_kernel(%arg0: i32, %arg1: memref<8x128xf32, #tpu.memory_space<vmem>>, %arg2: memref<128x256xbf16, #tpu.memory_space<vmem>>, %arg3: memref<1x256xf32, #tpu.memory_space<vmem>>, %arg4: memref<256x512xbf16, #tpu.memory_space<vmem>>, %arg5: memref<1x512xf32, #tpu.memory_space<vmem>>, %arg6: memref<512x256xbf16, #tpu.memory_space<vmem>>, %arg7: memref<1x256xf32, #tpu.memory_space<vmem>>, %arg8: memref<8x256xbf16, #tpu.memory_space<vmem>>) attributes {dimension_semantics = [#tpu.dimension_semantics<parallel>], iteration_bounds = array<i64: 1>, scalar_prefetch = 0 : i64, scratch_operands = 0 : i64, tpu.core_type = #tpu.core_type<tc>, window_params = [{transform_indices = @transform_0, window_bounds = array<i64: 8, 128>}, {pipeline_mode = #tpu.pipeline_mode<synchronous>, transform_indices = @transform_1, window_bounds = array<i64: 128, 256>}, {pipeline_mode = #tpu.pipeline_mode<synchronous>, transform_indices = @transform_2, window_bounds = array<i64: 1, 256>}, {pipeline_mode = #tpu.pipeline_mode<synchronous>, transform_indices = @transform_3, window_bounds = array<i64: 256, 512>}, {pipeline_mode = #tpu.pipeline_mode<synchronous>, transform_indices = @transform_4, window_bounds = array<i64: 1, 512>}, {pipeline_mode = #tpu.pipeline_mode<synchronous>, transform_indices = @transform_5, window_bounds = array<i64: 512, 256>}, {pipeline_mode = #tpu.pipeline_mode<synchronous>, transform_indices = @transform_6, window_bounds = array<i64: 1, 256>}, {transform_indices = @transform_7, window_bounds = array<i64: 8, 256>}]} {
    %c0 = arith.constant 0 : index
    %c0_0 = arith.constant 0 : index
    %0 = vector.load %arg1[%c0, %c0_0] : memref<8x128xf32, #tpu.memory_space<vmem>>, vector<8x128xf32>
    %1 = arith.truncf %0 : vector<8x128xf32> to vector<8x128xbf16>
    %c0_1 = arith.constant 0 : index
    %c0_2 = arith.constant 0 : index
    %2 = vector.load %arg2[%c0_1, %c0_2] : memref<128x256xbf16, #tpu.memory_space<vmem>>, vector<128x256xbf16>
    %cst = arith.constant dense<0.000000e+00> : vector<8x256xf32>
    %3 = tpu.matmul %1, %2, %cst {dimension_numbers = #tpu.dot_dimension_numbers<[1], [0], [0], [1], [0, 0, 1, 1], [], []>} : vector<8x128xbf16>, vector<128x256xbf16>, vector<8x256xf32> -> vector<8x256xf32>
    %c0_3 = arith.constant 0 : index
    %c0_4 = arith.constant 0 : index
    %4 = vector.load %arg3[%c0_3, %c0_4] : memref<1x256xf32, #tpu.memory_space<vmem>>, vector<1x256xf32>
    %5 = vector.broadcast %4 : vector<1x256xf32> to vector<8x256xf32>
    %6 = arith.addf %3, %5 : vector<8x256xf32>
    %cst_5 = arith.constant 0.000000e+00 : f32
    %7 = vector.broadcast %cst_5 : f32 to vector<8x256xf32>
    %8 = arith.maximumf %6, %7 : vector<8x256xf32>
    %9 = arith.truncf %8 : vector<8x256xf32> to vector<8x256xbf16>
    %c0_6 = arith.constant 0 : index
    %c0_7 = arith.constant 0 : index
    %10 = vector.load %arg4[%c0_6, %c0_7] : memref<256x512xbf16, #tpu.memory_space<vmem>>, vector<256x512xbf16>
    %cst_8 = arith.constant dense<0.000000e+00> : vector<8x512xf32>
    %11 = tpu.matmul %9, %10, %cst_8 {dimension_numbers = #tpu.dot_dimension_numbers<[1], [0], [0], [1], [0, 0, 1, 1], [], []>} : vector<8x256xbf16>, vector<256x512xbf16>, vector<8x512xf32> -> vector<8x512xf32>
    %c0_9 = arith.constant 0 : index
    %c0_10 = arith.constant 0 : index
    %12 = vector.load %arg5[%c0_9, %c0_10] : memref<1x512xf32, #tpu.memory_space<vmem>>, vector<1x512xf32>
    %13 = vector.broadcast %12 : vector<1x512xf32> to vector<8x512xf32>
    %14 = arith.addf %11, %13 : vector<8x512xf32>
    %cst_11 = arith.constant 0.000000e+00 : f32
    %15 = vector.broadcast %cst_11 : f32 to vector<8x512xf32>
    %16 = arith.maximumf %14, %15 : vector<8x512xf32>
    %17 = arith.truncf %16 : vector<8x512xf32> to vector<8x512xbf16>
    %c0_12 = arith.constant 0 : index
    %c0_13 = arith.constant 0 : index
    %18 = vector.load %arg6[%c0_12, %c0_13] : memref<512x256xbf16, #tpu.memory_space<vmem>>, vector<512x256xbf16>
    %cst_14 = arith.constant dense<0.000000e+00> : vector<8x256xf32>
    %19 = tpu.matmul %17, %18, %cst_14 {dimension_numbers = #tpu.dot_dimension_numbers<[1], [0], [0], [1], [0, 0, 1, 1], [], []>} : vector<8x512xbf16>, vector<512x256xbf16>, vector<8x256xf32> -> vector<8x256xf32>
    %c0_15 = arith.constant 0 : index
    %c0_16 = arith.constant 0 : index
    %20 = vector.load %arg7[%c0_15, %c0_16] : memref<1x256xf32, #tpu.memory_space<vmem>>, vector<1x256xf32>
    %21 = vector.broadcast %20 : vector<1x256xf32> to vector<8x256xf32>
    %22 = arith.addf %19, %21 : vector<8x256xf32>
    %23 = arith.truncf %22 : vector<8x256xf32> to vector<8x256xbf16>
    %24 = math.tanh %23 : vector<8x256xbf16>
    %c0_17 = arith.constant 0 : index
    %c0_18 = arith.constant 0 : index
    %25 = vector.load %arg8[%c0_17, %c0_18] : memref<8x256xbf16, #tpu.memory_space<vmem>>, vector<8x256xbf16>
    tpu.vector_store %arg8[%c0_17, %c0_18], %24 {strides = array<i32>} : memref<8x256xbf16, #tpu.memory_space<vmem>>, vector<8x256xbf16>,
    return
  }
  func.func @transform_0(%arg0: i32) -> (i32, i32) {
    %c0_i32 = arith.constant 0 : i32
    %c0_i32_0 = arith.constant 0 : i32
    return %arg0, %c0_i32 : i32, i32
  }
  func.func @transform_1(%arg0: i32) -> (i32, i32) {
    %c0_i32 = arith.constant 0 : i32
    %c0_i32_0 = arith.constant 0 : i32
    %c0_i32_1 = arith.constant 0 : i32
    return %c0_i32, %c0_i32_0 : i32, i32
  }
  func.func @transform_2(%arg0: i32) -> (i32, i32) {
    %c0_i32 = arith.constant 0 : i32
    %c0_i32_0 = arith.constant 0 : i32
    %c0_i32_1 = arith.constant 0 : i32
    return %c0_i32, %c0_i32_0 : i32, i32
  }
  func.func @transform_3(%arg0: i32) -> (i32, i32) {
    %c0_i32 = arith.constant 0 : i32
    %c0_i32_0 = arith.constant 0 : i32
    %c0_i32_1 = arith.constant 0 : i32
    return %c0_i32, %c0_i32_0 : i32, i32
  }
  func.func @transform_4(%arg0: i32) -> (i32, i32) {
    %c0_i32 = arith.constant 0 : i32
    %c0_i32_0 = arith.constant 0 : i32
    %c0_i32_1 = arith.constant 0 : i32
    return %c0_i32, %c0_i32_0 : i32, i32
  }
  func.func @transform_5(%arg0: i32) -> (i32, i32) {
    %c0_i32 = arith.constant 0 : i32
    %c0_i32_0 = arith.constant 0 : i32
    %c0_i32_1 = arith.constant 0 : i32
    return %c0_i32, %c0_i32_0 : i32, i32
  }
  func.func @transform_6(%arg0: i32) -> (i32, i32) {
    %c0_i32 = arith.constant 0 : i32
    %c0_i32_0 = arith.constant 0 : i32
    %c0_i32_1 = arith.constant 0 : i32
    return %c0_i32, %c0_i32_0 : i32, i32
  }
  func.func @transform_7(%arg0: i32) -> (i32, i32) {
    %c0_i32 = arith.constant 0 : i32
    %c0_i32_0 = arith.constant 0 : i32
    return %arg0, %c0_i32 : i32, i32
  }
}

module attributes {stable_mosaic.version = 11 : i64} {
  func.func @_mlp_kernel(%arg0: i32, %arg1: memref<8x128xf32, #tpu.memory_space<vmem>>, %arg2: memref<128x256xbf16, #tpu.memory_space<vmem>>, %arg3: memref<1x256xf32, #tpu.memory_space<vmem>>, %arg4: memref<256x512xbf16, #tpu.memory_space<vmem>>, %arg5: memref<1x512xf32, #tpu.memory_space<vmem>>, %arg6: memref<512x256xbf16, #tpu.memory_space<vmem>>, %arg7: memref<1x256xf32, #tpu.memory_space<vmem>>, %arg8: memref<8x256xbf16, #tpu.memory_space<vmem>>) attributes {dimension_semantics = [#tpu.dimension_semantics<parallel>], iteration_bounds = array<i64: 1>, scalar_prefetch = 0 : i64, scratch_operands = 0 : i64, tpu.core_type = #tpu.core_type<tc>, window_params = [{transform_indices = @transform_0, window_bounds = array<i64: 8, 128>}, {pipeline_mode = #tpu.pipeline_mode<synchronous>, transform_indices = @transform_1, window_bounds = array<i64: 128, 256>}, {pipeline_mode = #tpu.pipeline_mode<synchronous>, transform_indices = @transform_2, window_bounds = array<i64: 1, 256>}, {pipeline_mode = #tpu.pipeline_mode<synchronous>, transform_indices = @transform_3, window_bounds = array<i64: 256, 512>}, {pipeline_mode = #tpu.pipeline_mode<synchronous>, transform_indices = @transform_4, window_bounds = array<i64: 1, 512>}, {pipeline_mode = #tpu.pipeline_mode<synchronous>, transform_indices = @transform_5, window_bounds = array<i64: 512, 256>}, {pipeline_mode = #tpu.pipeline_mode<synchronous>, transform_indices = @transform_6, window_bounds = array<i64: 1, 256>}, {transform_indices = @transform_7, window_bounds = array<i64: 8, 256>}]} {
    %c0 = arith.constant 0 : index
    %c0_0 = arith.constant 0 : index
    %0 = vector.load %arg1[%c0, %c0_0] : memref<8x128xf32, #tpu.memory_space<vmem>>, vector<8x128xf32>
    %1 = arith.truncf %0 : vector<8x128xf32> to vector<8x128xbf16>
    %c0_1 = arith.constant 0 : index
    %c0_2 = arith.constant 0 : index
    %2 = vector.load %arg2[%c0_1, %c0_2] : memref<128x256xbf16, #tpu.memory_space<vmem>>, vector<128x256xbf16>
    %cst = arith.constant dense<0.000000e+00> : vector<8x256xf32>
    %3 = tpu.matmul %1, %2, %cst {dimension_numbers = #tpu.dot_dimension_numbers<[1], [0], [0], [1], [0, 0, 1, 1], [], []>} : vector<8x128xbf16>, vector<128x256xbf16>, vector<8x256xf32> -> vector<8x256xf32>
    %c0_3 = arith.constant 0 : index
    %c0_4 = arith.constant 0 : index
    %4 = vector.load %arg3[%c0_3, %c0_4] : memref<1x256xf32, #tpu.memory_space<vmem>>, vector<1x256xf32>
    %5 = vector.broadcast %4 : vector<1x256xf32> to vector<8x256xf32>
    %6 = arith.addf %3, %5 : vector<8x256xf32>
    %cst_5 = arith.constant 0.000000e+00 : f32
    %7 = vector.broadcast %cst_5 : f32 to vector<8x256xf32>
    %8 = arith.maximumf %6, %7 : vector<8x256xf32>
    %9 = arith.truncf %8 : vector<8x256xf32> to vector<8x256xbf16>
    %c0_6 = arith.constant 0 : index
    %c0_7 = arith.constant 0 : index
    %10 = vector.load %arg4[%c0_6, %c0_7] : memref<256x512xbf16, #tpu.memory_space<vmem>>, vector<256x512xbf16>
    %cst_8 = arith.constant dense<0.000000e+00> : vector<8x512xf32>
    %11 = tpu.matmul %9, %10, %cst_8 {dimension_numbers = #tpu.dot_dimension_numbers<[1], [0], [0], [1], [0, 0, 1, 1], [], []>} : vector<8x256xbf16>, vector<256x512xbf16>, vector<8x512xf32> -> vector<8x512xf32>
    %c0_9 = arith.constant 0 : index
    %c0_10 = arith.constant 0 : index
    %12 = vector.load %arg5[%c0_9, %c0_10] : memref<1x512xf32, #tpu.memory_space<vmem>>, vector<1x512xf32>
    %13 = vector.broadcast %12 : vector<1x512xf32> to vector<8x512xf32>
    %14 = arith.addf %11, %13 : vector<8x512xf32>
    %cst_11 = arith.constant 0.000000e+00 : f32
    %15 = vector.broadcast %cst_11 : f32 to vector<8x512xf32>
    %16 = arith.maximumf %14, %15 : vector<8x512xf32>
    %17 = arith.truncf %16 : vector<8x512xf32> to vector<8x512xbf16>
    %c0_12 = arith.constant 0 : index
    %c0_13 = arith.constant 0 : index
    %18 = vector.load %arg6[%c0_12, %c0_13] : memref<512x256xbf16, #tpu.memory_space<vmem>>, vector<512x256xbf16>
    %cst_14 = arith.constant dense<0.000000e+00> : vector<8x256xf32>
    %19 = tpu.matmul %17, %18, %cst_14 {dimension_numbers = #tpu.dot_dimension_numbers<[1], [0], [0], [1], [0, 0, 1, 1], [], []>} : vector<8x512xbf16>, vector<512x256xbf16>, vector<8x256xf32> -> vector<8x256xf32>
    %c0_15 = arith.constant 0 : index
    %c0_16 = arith.constant 0 : index
    %20 = vector.load %arg7[%c0_15, %c0_16] : memref<1x256xf32, #tpu.memory_space<vmem>>, vector<1x256xf32>
    %21 = vector.broadcast %20 : vector<1x256xf32> to vector<8x256xf32>
    %22 = arith.addf %19, %21 : vector<8x256xf32>
    %23 = arith.truncf %22 : vector<8x256xf32> to vector<8x256xbf16>
    %24 = math.tanh %23 : vector<8x256xbf16>
    %c0_17 = arith.constant 0 : index
    %c0_18 = arith.constant 0 : index
    %25 = vector.load %arg8[%c0_17, %c0_18] : memref<8x256xbf16, #tpu.memory_space<vmem>>, vector<8x256xbf16>
    tpu.vector_store %arg8[%c0_17, %c0_18], %24 {strides = array<i32>} : memref<8x256xbf16, #tpu.memory_space<vmem>>, vector<8x256xbf16>,
    return
  }
  func.func @transform_0(%arg0: i32) -> (i32, i32) {
    %c0_i32 = arith.constant 0 : i32
    %c0_i32_0 = arith.constant 0 : i32
    return %arg0, %c0_i32 : i32, i32
  }
  func.func @transform_1(%arg0: i32) -> (i32, i32) {
    %c0_i32 = arith.constant 0 : i32
    %c0_i32_0 = arith.constant 0 : i32
    %c0_i32_1 = arith.constant 0 : i32
    return %c0_i32, %c0_i32_0 : i32, i32
  }
  func.func @transform_2(%arg0: i32) -> (i32, i32) {
    %c0_i32 = arith.constant 0 : i32
    %c0_i32_0 = arith.constant 0 : i32
    %c0_i32_1 = arith.constant 0 : i32
    return %c0_i32, %c0_i32_0 : i32, i32
  }
  func.func @transform_3(%arg0: i32) -> (i32, i32) {
    %c0_i32 = arith.constant 0 : i32
    %c0_i32_0 = arith.constant 0 : i32
    %c0_i32_1 = arith.constant 0 : i32
    return %c0_i32, %c0_i32_0 : i32, i32
  }
  func.func @transform_4(%arg0: i32) -> (i32, i32) {
    %c0_i32 = arith.constant 0 : i32
    %c0_i32_0 = arith.constant 0 : i32
    %c0_i32_1 = arith.constant 0 : i32
    return %c0_i32, %c0_i32_0 : i32, i32
  }
  func.func @transform_5(%arg0: i32) -> (i32, i32) {
    %c0_i32 = arith.constant 0 : i32
    %c0_i32_0 = arith.constant 0 : i32
    %c0_i32_1 = arith.constant 0 : i32
    return %c0_i32, %c0_i32_0 : i32, i32
  }
  func.func @transform_6(%arg0: i32) -> (i32, i32) {
    %c0_i32 = arith.constant 0 : i32
    %c0_i32_0 = arith.constant 0 : i32
    %c0_i32_1 = arith.constant 0 : i32
    return %c0_i32, %c0_i32_0 : i32, i32
  }
  func.func @transform_7(%arg0: i32) -> (i32, i32) {
    %c0_i32 = arith.constant 0 : i32
    %c0_i32_0 = arith.constant 0 : i32
    return %arg0, %c0_i32 : i32, i32
  }
}

</mosaic_0001>

<bundles_post_ra>
// kernel: tpu_custom_call.1
= control target key start
LH: loop header
LB: loop body
LE: loop exit
PB: predicated region body
PF: predicated region fallthrough
CT: control target
= control target key end

     0   :  { %12 = vsyncpa [#allocation3], 0  ;;  %s1817_s0 = inlined_call_operand.hbm [shape: f32[8,128], index: 0, kind: input, shape index: {}]   ;;  %s1818_s1 = inlined_call_operand.hbm [shape: bf16[128,256], index: 1, kind: input, shape index: {}]   ;;  %s1819_s2 = inlined_call_operand.vmem [shape: f32[1,256], index: 2, kind: input, shape index: {}]   ;;  %s1820_s3 = inlined_call_operand.hbm [shape: bf16[256,512], index: 3, kind: input, shape index: {}]   ;;  %s1821_s4 = inlined_call_operand.vmem [shape: f32[1,512], index: 4, kind: input, shape index: {}]   ;;  %s1822_s5 = inlined_call_operand.hbm [shape: bf16[512,256], index: 5, kind: input, shape index: {}]   ;;  %s1823_s6 = inlined_call_operand.vmem [shape: f32[1,256], index: 6, kind: input, shape index: {}]   ;;  %s1824_s7 = inlined_call_operand.hbm [shape: bf16[8,256], index: 7, kind: output, shape index: {}]  }
   0x1   :  { %13 = vsyncpa [#allocation6], 0 }
   0x2   :  { %14 = vsyncpa [#allocation9], 0 }
   0x3   :  { %15 = vsyncpa [#allocation4], 0  ;;  %s1721_s24 = smov [#allocation5]  }
   0x4   :  { %s31_s25 = sshll.u32 %s1721_s24, 4  ;;  %s32_s25 = int_to_ptr.vmem [resolvable:$true] %s31_s25 }
   0x5   :  { %s1621_s26 = scalar_lea.vmem %s32_s25, 2048  ;;  %p1626_p1 = scmp.lt.s32.totalorder %s32_s25, %s32_s25 }
   0x6   :  { %p1622_p0 = scmp.ne.s32.totalorder %s32_s25, %s1621_s26  ;;  %p1627_p2 = scmp.lt.s32.totalorder %s1621_s26, %s1621_s26 }
   0x8   :  { %p1628_p3 = por %p1627_p2, %p1626_p1 }
   0xa   :  { %p1629_p4 = pnand %p1628_p3, %p1622_p0 }
   0xc   :  { %1632 = shalt.err (!%p1629_p4)
}
   0xd   :  { %s1722_s27 = smov 128   ;;  %s1723_s28 = smov 8  }
   0xe   :  { %37 = dma.hbm_to_vmem [thread:$0]  %s1818_s1, 2048, %s32_s25, [#allocation6], %s1722_s27, %s1722_s27, %s1723_s28  }
   0xf   :  { %s1724_s8 = smov [#allocation2]   ;;  %s1725_s10 = smov [#allocation7]  }
  0x10   :  { %s22_s9 = sshll.u32 %s1724_s8, 4  ;;  %s45_s11 = sshll.u32 %s1725_s10, 4  ;;  %s23_s9 = int_to_ptr.vmem [resolvable:$true] %s22_s9  ;;  %s46_s11 = int_to_ptr.vmem [resolvable:$true] %s45_s11 }
  0x11   :  { %s1641_s12 = scalar_lea.vmem %s23_s9, 128  ;;  %p1646_p6 = scmp.lt.s32.totalorder %s23_s9, %s23_s9 }
  0x12   :  { %p1642_p5 = scmp.ne.s32.totalorder %s23_s9, %s1641_s12  ;;  %p1647_p7 = scmp.lt.s32.totalorder %s1641_s12, %s1641_s12 }
  0x14   :  { %p1648_p8 = por %p1647_p7, %p1646_p6 }
  0x16   :  { %p1649_p9 = pnand %p1648_p8, %p1642_p5 }
  0x18   :  { %1652 = shalt.err (!%p1649_p9)
}
  0x19   :  { %25 = dma.hbm_to_vmem [thread:$0]  %s1817_s0, 128, %s23_s9, [#allocation3]  }
  0x1a   :  { %s1661_s15 = scalar_lea.vmem %s46_s11, 8192  ;;  %p1666_p11 = scmp.lt.s32.totalorder %s46_s11, %s46_s11 }
  0x1b   :  { %p1662_p10 = scmp.ne.s32.totalorder %s46_s11, %s1661_s15  ;;  %p1667_p12 = scmp.lt.s32.totalorder %s1661_s15, %s1661_s15 }
  0x1d   :  { %p1668_p13 = por %p1667_p12, %p1666_p11 }
  0x1f   :  { %p1669_p0 = pnand %p1668_p13, %p1662_p10 }
  0x21   :  { %1672 = shalt.err (!%p1669_p0)
}
  0x22   :  { %s1726_s1 = smov 256   ;;  %s1727_s16 = smov 16  }
  0x23   :  { %51 = dma.hbm_to_vmem [thread:$0]  %s1820_s3, 8192, %s46_s11, [#allocation6], %s1726_s1, %s1726_s1, %s1727_s16  }
  0x24   :  { %s1728_s19 = smov [#allocation8]  }
  0x25   :  { %s59_s20 = sshll.u32 %s1728_s19, 4  ;;  %s60_s20 = int_to_ptr.vmem [resolvable:$true] %s59_s20 }
  0x26   :  { %s1681_s21 = scalar_lea.vmem %s60_s20, 8192  ;;  %p1686_p2 = scmp.lt.s32.totalorder %s60_s20, %s60_s20 }
  0x27   :  { %p1682_p1 = scmp.ne.s32.totalorder %s60_s20, %s1681_s21  ;;  %p1687_p3 = scmp.lt.s32.totalorder %s1681_s21, %s1681_s21 }
  0x29   :  { %p1688_p4 = por %p1687_p3, %p1686_p2 }
  0x2b   :  { %p1689_p5 = pnand %p1688_p4, %p1682_p1 }
  0x2d   :  { %1692 = shalt.err (!%p1689_p5)
}
  0x2e   :  { %65 = dma.hbm_to_vmem [thread:$0]  %s1822_s5, 8192, %s60_s20, [#allocation9], %s1722_s27, %s1722_s27, %s1723_s28  }
  0x2f   :  { %1713 = dma.done.wait [#allocation3], 128  }
  0x30   :  { %1714 = vsyncadd [#allocation3], 4294967168 }
  0x31   :  { %1715 = dma.done.wait [#allocation6], 10240  }
  0x32   :  { %1716 = vsyncadd [#allocation6], 4294957056 }
  0x33   :  { %1717 = dma.done.wait [#allocation9], 8192  }
  0x34   :  { %1718 = vsyncadd [#allocation9], 4294959104  ;;  %v1729_v0 = vmov 0   ;;  %v1393_v1 = vld [vmem:[#allocation5 + $0x74] ss:$8 sps:$4 sm:$0xff]  }
  0x35   :  { %223 = vmatprep.mubr.bf16.mxu0 %v1729_v0  ;;  %v1395_v2 = vld [vmem:[#allocation5 + $0x70] ss:$8 sps:$4 sm:$0xff]   ;;  %191 = vmatprep.subr.bf16.mxu0 %v1393_v1  ;;  %v1396_v3 = vld [vmem:[#allocation5 + $0x64] ss:$8 sps:$4 sm:$0xff]   ;;  %v1398_v4 = vld [vmem:[#allocation5 + $0x60] ss:$8 sps:$4 sm:$0xff]  }
  0x36   :  { %192 = vmatpush1.bf16.msra.mxu0 %v1395_v2  ;;  %v1399_v5 = vld [vmem:[#allocation5 + $0x54] ss:$8 sps:$4 sm:$0xff]   ;;  %v1401_v6 = vld [vmem:[#allocation5 + $0x50] ss:$8 sps:$4 sm:$0xff]   ;;  %v1402_v7 = vld [vmem:[#allocation5 + $0x44] ss:$8 sps:$4 sm:$0xff]  }
  0x37   :  { %193 = vmatprep.subr.bf16.mxu0 %v1396_v3  ;;  %v1404_v8 = vld [vmem:[#allocation5 + $0x40] ss:$8 sps:$4 sm:$0xff]   ;;  %v1417_v9 = vld [vmem:[#allocation7 + $0xe4] ss:$16 sps:$4 sm:$0xff]   ;;  %v1407_v13 = vld [vmem:[#allocation5 + $0x30] ss:$8 sps:$4 sm:$0xff]  }
  0x38   :  { %v1405_v10 = vld [vmem:[#allocation5 + $0x34] ss:$8 sps:$4 sm:$0xff]   ;;  %642 = vmatprep.subr.bf16.mxu1 %v1417_v9  ;;  %v1422_v11 = vld [vmem:[#allocation7 + $0xe0] ss:$16 sps:$4 sm:$0xff]   ;;  %v1408_v14 = vld [vmem:[#allocation5 + $0x24] ss:$8 sps:$4 sm:$0xff]  }
  0x39   :  { %v1423_v12 = vld [vmem:[#allocation7 + $0xc4] ss:$16 sps:$4 sm:$0xff]   ;;  %643 = vmatpush1.bf16.msra.mxu1 %v1422_v11  ;;  %v1428_v15 = vld [vmem:[#allocation7 + $0xc0] ss:$16 sps:$4 sm:$0xff]   ;;  %v81_v26 = vld [vmem:[#allocation2] sm:$0xff] }
  0x3a   :  { %194 = vmatpush1.bf16.msra.mxu0 %v1398_v4  ;;  %644 = vmatprep.subr.bf16.mxu1 %v1423_v12  ;;  %v1429_v16 = vld [vmem:[#allocation7 + $0xa4] ss:$16 sps:$4 sm:$0xff]   ;;  %v1410_v17 = vld [vmem:[#allocation5 + $0x20] ss:$8 sps:$4 sm:$0xff]   ;;  %v1413_v21 = vld [vmem:[#allocation5 + $0x10] ss:$8 sps:$4 sm:$0xff]   ;;  %v82_v30 = vpack.c.bf16 %v81_v26, %v81_v26 }
  0x3b   :  { %195 = vmatprep.subr.bf16.mxu0 %v1399_v5  ;;  %v1411_v18 = vld [vmem:[#allocation5 + $0x14] ss:$8 sps:$4 sm:$0xff]   ;;  %v1434_v19 = vld [vmem:[#allocation7 + $0xa0] ss:$16 sps:$4 sm:$0xff]   ;;  %v1414_v22 = vld [vmem:[#allocation5 + $0x4] ss:$8 sps:$4 sm:$0xff]  }
  0x3c   :  { %v1435_v20 = vld [vmem:[#allocation7 + $0x84] ss:$16 sps:$4 sm:$0xff]   ;;  %v1440_v23 = vld [vmem:[#allocation7 + $0x80] ss:$16 sps:$4 sm:$0xff]   ;;  %v1421_v27 = vld [vmem:[#allocation7 + $0xec] ss:$16 sps:$4 sm:$0xff]  }
  0x3d   :  { %645 = vmatpush1.bf16.msra.mxu1 %v1428_v15  ;;  %v1441_v24 = vld [vmem:[#allocation7 + $0x64] ss:$16 sps:$4 sm:$0xff]   ;;  %v1416_v25 = vld [vmem:[#allocation5] ss:$8 sps:$4 sm:$0xff]   ;;  %v1427_v32 = vld [vmem:[#allocation7 + $0xcc] ss:$16 sps:$4 sm:$0xff]  }
  0x3e   :  { %196 = vmatpush1.bf16.msra.mxu0 %v1401_v6  ;;  %646 = vmatprep.subr.bf16.mxu1 %v1429_v16  ;;  %v1446_v28 = vld [vmem:[#allocation7 + $0x60] ss:$16 sps:$4 sm:$0xff]   ;;  %v1447_v29 = vld [vmem:[#allocation7 + $0x44] ss:$16 sps:$4 sm:$0xff]   ;;  %v1419_v31 = vld [vmem:[#allocation7 + $0xe8] ss:$16 sps:$4 sm:$0xff]  }
  0x3f   :  { %197 = vmatprep.subr.bf16.mxu0 %v1402_v7  ;;  %v1452_v33 = vld [vmem:[#allocation7 + $0x40] ss:$16 sps:$4 sm:$0xff]   ;;  %v1453_v34 = vld [vmem:[#allocation7 + $0x24] ss:$16 sps:$4 sm:$0xff]   ;;  %v1425_v35 = vld [vmem:[#allocation7 + $0xc8] ss:$16 sps:$4 sm:$0xff]  }
  0x40   :  { %v1433_v36 = vld [vmem:[#allocation7 + $0xac] ss:$16 sps:$4 sm:$0xff]   ;;  %v1458_v37 = vld [vmem:[#allocation7 + $0x20] ss:$16 sps:$4 sm:$0xff]   ;;  %v1459_v38 = vld [vmem:[#allocation7 + $0x4] ss:$16 sps:$4 sm:$0xff]  }
  0x41   :  { %647 = vmatpush1.bf16.msra.mxu1 %v1434_v19  ;;  %v1431_v39 = vld [vmem:[#allocation7 + $0xa8] ss:$16 sps:$4 sm:$0xff]   ;;  %v1439_v40 = vld [vmem:[#allocation7 + $0x8c] ss:$16 sps:$4 sm:$0xff]   ;;  %v1464_v41 = vld [vmem:[#allocation7] ss:$16 sps:$4 sm:$0xff]  }
  0x42   :  { %198 = vmatpush1.bf16.msra.mxu0 %v1404_v8  ;;  %648 = vmatprep.subr.bf16.mxu1 %v1435_v20  ;;  %v1465_v42 = vld [vmem:[#allocation7 + $0x1e4] ss:$16 sps:$4 sm:$0xff]   ;;  %v1437_v43 = vld [vmem:[#allocation7 + $0x88] ss:$16 sps:$4 sm:$0xff]   ;;  %v1445_v44 = vld [vmem:[#allocation7 + $0x6c] ss:$16 sps:$4 sm:$0xff]  }
  0x43   :  { %199 = vmatprep.subr.bf16.mxu0 %v1405_v10  ;;  %v1470_v45 = vld [vmem:[#allocation7 + $0x1e0] ss:$16 sps:$4 sm:$0xff]   ;;  %v1471_v46 = vld [vmem:[#allocation7 + $0x1c4] ss:$16 sps:$4 sm:$0xff]   ;;  %v1443_v47 = vld [vmem:[#allocation7 + $0x68] ss:$16 sps:$4 sm:$0xff]  }
  0x44   :  { %v1476_v48 = vld [vmem:[#allocation7 + $0x1c0] ss:$16 sps:$4 sm:$0xff]   ;;  %v1451_v49 = vld [vmem:[#allocation7 + $0x4c] ss:$16 sps:$4 sm:$0xff]   ;;  %v1477_v50 = vld [vmem:[#allocation7 + $0x1a4] ss:$16 sps:$4 sm:$0xff]  }
  0x45   :  { %649 = vmatpush1.bf16.msra.mxu1 %v1440_v23  ;;  %v1449_v51 = vld [vmem:[#allocation7 + $0x48] ss:$16 sps:$4 sm:$0xff]   ;;  %v1482_v52 = vld [vmem:[#allocation7 + $0x1a0] ss:$16 sps:$4 sm:$0xff]   ;;  %v1457_v53 = vld [vmem:[#allocation7 + $0x2c] ss:$16 sps:$4 sm:$0xff]  }
  0x46   :  { %200 = vmatpush1.bf16.msra.mxu0 %v1407_v13  ;;  %650 = vmatprep.subr.bf16.mxu1 %v1441_v24  ;;  %v1483_v54 = vld [vmem:[#allocation7 + $0x184] ss:$16 sps:$4 sm:$0xff]   ;;  %v1455_v55 = vld [vmem:[#allocation7 + $0x28] ss:$16 sps:$4 sm:$0xff]   ;;  %v1488_v56 = vld [vmem:[#allocation7 + $0x180] ss:$16 sps:$4 sm:$0xff]  }
  0x47   :  { %201 = vmatprep.subr.bf16.mxu0 %v1408_v14  ;;  %v1463_v57 = vld [vmem:[#allocation7 + $0xc] ss:$16 sps:$4 sm:$0xff]   ;;  %v1489_v58 = vld [vmem:[#allocation7 + $0x164] ss:$16 sps:$4 sm:$0xff]   ;;  %v1461_v59 = vld [vmem:[#allocation7 + $0x8] ss:$16 sps:$4 sm:$0xff]  }
  0x48   :  { %v1494_v60 = vld [vmem:[#allocation7 + $0x160] ss:$16 sps:$4 sm:$0xff]   ;;  %v1469_v61 = vld [vmem:[#allocation7 + $0x1ec] ss:$16 sps:$4 sm:$0xff]   ;;  %v1495_v62 = vld [vmem:[#allocation7 + $0x144] ss:$16 sps:$4 sm:$0xff]  }
  0x49   :  { %651 = vmatpush1.bf16.msra.mxu1 %v1446_v28  ;;  %v1467_v63 = vld [vmem:[#allocation7 + $0x1e8] ss:$16 sps:$4 sm:$0xff]   ;;  %v1500_v0 = vld [vmem:[#allocation7 + $0x140] ss:$16 sps:$4 sm:$0xff]   ;;  %v1475_v1 = vld [vmem:[#allocation7 + $0x1cc] ss:$16 sps:$4 sm:$0xff]  }
  0x4a   :  { %202 = vmatpush1.bf16.msra.mxu0 %v1410_v17  ;;  %652 = vmatprep.subr.bf16.mxu1 %v1447_v29  ;;  %v1473_v2 = vld [vmem:[#allocation7 + $0x1c8] ss:$16 sps:$4 sm:$0xff]   ;;  %v1481_v3 = vld [vmem:[#allocation7 + $0x1ac] ss:$16 sps:$4 sm:$0xff]   ;;  %v1501_v11 = vld [vmem:[#allocation7 + $0x124] ss:$16 sps:$4 sm:$0xff]  }
  0x4b   :  { %203 = vmatprep.subr.bf16.mxu0 %v1411_v18  ;;  %v1479_v4 = vld [vmem:[#allocation7 + $0x1a8] ss:$16 sps:$4 sm:$0xff]   ;;  %v1487_v5 = vld [vmem:[#allocation7 + $0x18c] ss:$16 sps:$4 sm:$0xff]   ;;  %v1506_v14 = vld [vmem:[#allocation7 + $0x120] ss:$16 sps:$4 sm:$0xff]  }
  0x4c   :  { %v1485_v6 = vld [vmem:[#allocation7 + $0x188] ss:$16 sps:$4 sm:$0xff]   ;;  %v1493_v7 = vld [vmem:[#allocation7 + $0x16c] ss:$16 sps:$4 sm:$0xff]   ;;  %v1507_v15 = vld [vmem:[#allocation7 + $0x104] ss:$16 sps:$4 sm:$0xff]  }
  0x4d   :  { %653 = vmatpush1.bf16.msra.mxu1 %v1452_v33  ;;  %v1491_v8 = vld [vmem:[#allocation7 + $0x168] ss:$16 sps:$4 sm:$0xff]   ;;  %v1499_v9 = vld [vmem:[#allocation7 + $0x14c] ss:$16 sps:$4 sm:$0xff]   ;;  %v1512_v18 = vld [vmem:[#allocation7 + $0x100] ss:$16 sps:$4 sm:$0xff]  }
  0x4e   :  { %204 = vmatpush1.bf16.msra.mxu0 %v1413_v21  ;;  %654 = vmatprep.subr.bf16.mxu1 %v1453_v34  ;;  %v1497_v10 = vld [vmem:[#allocation7 + $0x148] ss:$16 sps:$4 sm:$0xff]   ;;  %v1505_v12 = vld [vmem:[#allocation7 + $0x12c] ss:$16 sps:$4 sm:$0xff]   ;;  %v101_v21 = vlaneseq }
  0x4f   :  { %205 = vmatprep.subr.bf16.mxu0 %v1414_v22  ;;  %v1503_v13 = vld [vmem:[#allocation7 + $0x128] ss:$16 sps:$4 sm:$0xff]   ;;  %v1511_v16 = vld [vmem:[#allocation7 + $0x10c] ss:$16 sps:$4 sm:$0xff]  }
  0x50   :  { %v1509_v17 = vld [vmem:[#allocation7 + $0x108] ss:$16 sps:$4 sm:$0xff]   ;;  %v1515_v19 = vld [vmem:[#allocation8 + $0x74] ss:$8 sps:$4 sm:$0xff]   ;;  %v1789_v22 = vshrl.u32 %v101_v21, 7 }
  0x51   :  { %655 = vmatpush1.bf16.msra.mxu1 %v1458_v37  ;;  %v1518_v20 = vld [vmem:[#allocation8 + $0x174] ss:$8 sps:$4 sm:$0xff]   ;;  %v99_v24 = vld [vmem:[%s1819_s2] sm:$0x3] }
  0x52   :  { %206 = vmatpush1.bf16.msra.mxu0 %v1416_v25  ;;  %656 = vmatprep.subr.bf16.mxu1 %v1459_v38  ;;  %v1792_v23 = vsub.s32 0, %v1789_v22  ;;  %v1798_v25 = vsub.s32 1, %v1789_v22  ;;  %v1513_v37 = vld [vmem:[#allocation8 + $0x70] ss:$8 sps:$4 sm:$0xff]   ;;  %v1590_v21 = vld [vmem:[#allocation8 + $0x1b4] ss:$8 sps:$4 sm:$0xff]  }
  0x53   :  { %683 = vmatprep.subr.bf16.mxu0 %v1421_v27  ;;  %v1516_v38 = vld [vmem:[#allocation8 + $0x170] ss:$8 sps:$4 sm:$0xff]  }
  0x54   :  { %v104_v26 = vrot.slane %v99_v24, %v1792_v23  ;;  %v108_v27 = vrot.slane %v99_v24, %v1798_v25  ;;  %v1585_v24 = vld [vmem:[#allocation8 + $0xb0] ss:$8 sps:$4 sm:$0xff]  }
  0x55   :  { %224 = vmatmul.mubr.bf16.vlgmr.msra.gmra.mxu0 %v82_v30  ;;  %657 = vmatpush1.bf16.msra.mxu1 %v1464_v41  ;;  %v1524_v41 = vld [vmem:[#allocation8 + $0x164] ss:$8 sps:$4 sm:$0xff]  }
  0x56   :  { %684 = vmatpush1.bf16.msra.mxu0 %v1419_v31  ;;  %658 = vmatprep.subr.bf16.mxu1 %v1465_v42  ;;  %v1519_v42 = vld [vmem:[#allocation8 + $0x60] ss:$8 sps:$4 sm:$0xff]  }
  0x57   :  { %685 = vmatprep.subr.bf16.mxu0 %v1427_v32 }
  0x59   :  { %659 = vmatpush2.bf16.msra.mxu1 %v1470_v45  ;;  %v1530_v45 = vld [vmem:[#allocation8 + $0x154] ss:$8 sps:$4 sm:$0xff]  }
  0x5a   :  { %686 = vmatpush1.bf16.msra.mxu0 %v1425_v35  ;;  %660 = vmatprep.subr.bf16.mxu1 %v1471_v46  ;;  %v1525_v46 = vld [vmem:[#allocation8 + $0x50] ss:$8 sps:$4 sm:$0xff]  }
  0x5b   :  { %687 = vmatprep.subr.bf16.mxu0 %v1433_v36 }
  0x5d   :  { %661 = vmatpush2.bf16.msra.mxu1 %v1476_v48  ;;  %v1533_v48 = vld [vmem:[#allocation8 + $0x44] ss:$8 sps:$4 sm:$0xff]  }
  0x5e   :  { %688 = vmatpush1.bf16.msra.mxu0 %v1431_v39  ;;  %662 = vmatprep.subr.bf16.mxu1 %v1477_v50  ;;  %v1531_v50 = vld [vmem:[#allocation8 + $0x40] ss:$8 sps:$4 sm:$0xff]  }
  0x5f   :  { %689 = vmatprep.subr.bf16.mxu0 %v1439_v40  ;;  %v1521_v40 = vld [vmem:[#allocation8 + $0x64] ss:$8 sps:$4 sm:$0xff]  }
  0x61   :  { %663 = vmatpush2.bf16.msra.mxu1 %v1482_v52  ;;  %v1539_v52 = vld [vmem:[#allocation8 + $0x34] ss:$8 sps:$4 sm:$0xff]  }
  0x62   :  { %690 = vmatpush1.bf16.msra.mxu0 %v1437_v43  ;;  %664 = vmatprep.subr.bf16.mxu1 %v1483_v54  ;;  %v1522_v43 = vld [vmem:[#allocation8 + $0x160] ss:$8 sps:$4 sm:$0xff]   ;;  %v1537_v54 = vld [vmem:[#allocation8 + $0x30] ss:$8 sps:$4 sm:$0xff]  }
  0x63   :  { %691 = vmatprep.subr.bf16.mxu0 %v1445_v44  ;;  %v1527_v44 = vld [vmem:[#allocation8 + $0x54] ss:$8 sps:$4 sm:$0xff]  }
  0x65   :  { %665 = vmatpush2.bf16.msra.mxu1 %v1488_v56  ;;  %v1545_v56 = vld [vmem:[#allocation8 + $0x24] ss:$8 sps:$4 sm:$0xff]  }
  0x66   :  { %692 = vmatpush1.bf16.msra.mxu0 %v1443_v47  ;;  %666 = vmatprep.subr.bf16.mxu1 %v1489_v58  ;;  %v1528_v47 = vld [vmem:[#allocation8 + $0x150] ss:$8 sps:$4 sm:$0xff]   ;;  %v1543_v58 = vld [vmem:[#allocation8 + $0x20] ss:$8 sps:$4 sm:$0xff]  }
  0x67   :  { %693 = vmatprep.subr.bf16.mxu0 %v1451_v49  ;;  %v1536_v49 = vld [vmem:[#allocation8 + $0x144] ss:$8 sps:$4 sm:$0xff]  }
  0x69   :  { %667 = vmatpush2.bf16.msra.mxu1 %v1494_v60  ;;  %v1551_v60 = vld [vmem:[#allocation8 + $0x14] ss:$8 sps:$4 sm:$0xff]  }
  0x6a   :  { %694 = vmatpush1.bf16.msra.mxu0 %v1449_v51  ;;  %668 = vmatprep.subr.bf16.mxu1 %v1495_v62  ;;  %v1534_v51 = vld [vmem:[#allocation8 + $0x140] ss:$8 sps:$4 sm:$0xff]   ;;  %v1549_v62 = vld [vmem:[#allocation8 + $0x10] ss:$8 sps:$4 sm:$0xff]  }
  0x6b   :  { %695 = vmatprep.subr.bf16.mxu0 %v1457_v53  ;;  %v1542_v53 = vld [vmem:[#allocation8 + $0x134] ss:$8 sps:$4 sm:$0xff]  }
  0x6d   :  { %669 = vmatpush2.bf16.msra.mxu1 %v1500_v0  ;;  %v1557_v0 = vld [vmem:[#allocation8 + $0x4] ss:$8 sps:$4 sm:$0xff]  }
  0x6e   :  { %696 = vmatpush1.bf16.msra.mxu0 %v1455_v55  ;;  %670 = vmatprep.subr.bf16.mxu1 %v1501_v11  ;;  %v1540_v55 = vld [vmem:[#allocation8 + $0x130] ss:$8 sps:$4 sm:$0xff]   ;;  %v1570_v11 = vld [vmem:[#allocation8 + $0x1e0] ss:$8 sps:$4 sm:$0xff]  }
  0x6f   :  { %697 = vmatprep.subr.bf16.mxu0 %v1463_v57  ;;  %v1548_v57 = vld [vmem:[#allocation8 + $0x124] ss:$8 sps:$4 sm:$0xff]  }
  0x71   :  { %671 = vmatpush2.bf16.msra.mxu1 %v1506_v14  ;;  %v1573_v14 = vld [vmem:[#allocation8 + $0xd0] ss:$8 sps:$4 sm:$0xff]  }
  0x72   :  { %698 = vmatpush1.bf16.msra.mxu0 %v1461_v59  ;;  %672 = vmatprep.subr.bf16.mxu1 %v1507_v15  ;;  %v1546_v59 = vld [vmem:[#allocation8 + $0x120] ss:$8 sps:$4 sm:$0xff]   ;;  %v1576_v15 = vld [vmem:[#allocation8 + $0x1d0] ss:$8 sps:$4 sm:$0xff]  }
  0x73   :  { %699 = vmatprep.subr.bf16.mxu0 %v1469_v61  ;;  %v1554_v61 = vld [vmem:[#allocation8 + $0x114] ss:$8 sps:$4 sm:$0xff]  }
  0x75   :  { %673 = vmatpush2.bf16.msra.mxu1 %v1512_v18  ;;  %v1579_v18 = vld [vmem:[#allocation8 + $0xc0] ss:$8 sps:$4 sm:$0xff]  }
  0x76   :  { %700 = vmatpush2.bf16.msra.mxu0 %v1467_v63  ;;  %1128 = vmatprep.subr.bf16.mxu1 %v1515_v19  ;;  %v1552_v63 = vld [vmem:[#allocation8 + $0x110] ss:$8 sps:$4 sm:$0xff]   ;;  %v1582_v19 = vld [vmem:[#allocation8 + $0x1c0] ss:$8 sps:$4 sm:$0xff]  }
  0x77   :  { %701 = vmatprep.subr.bf16.mxu0 %v1475_v1  ;;  %v1560_v1 = vld [vmem:[#allocation8 + $0x104] ss:$8 sps:$4 sm:$0xff]  }
  0x7a   :  { %702 = vmatpush2.bf16.msra.mxu0 %v1473_v2  ;;  %v1555_v2 = vld [vmem:[#allocation8] ss:$8 sps:$4 sm:$0xff]  }
  0x7b   :  { %703 = vmatprep.subr.bf16.mxu0 %v1481_v3  ;;  %v1558_v3 = vld [vmem:[#allocation8 + $0x100] ss:$8 sps:$4 sm:$0xff]  }
  0x7e   :  { %704 = vmatpush2.bf16.msra.mxu0 %v1479_v4  ;;  %v1563_v4 = vld [vmem:[#allocation8 + $0xf4] ss:$8 sps:$4 sm:$0xff]  }
  0x7f   :  { %705 = vmatprep.subr.bf16.mxu0 %v1487_v5  ;;  %v1566_v5 = vld [vmem:[#allocation8 + $0x1f4] ss:$8 sps:$4 sm:$0xff]  }
  0x82   :  { %706 = vmatpush2.bf16.msra.mxu0 %v1485_v6  ;;  %v1561_v6 = vld [vmem:[#allocation8 + $0xf0] ss:$8 sps:$4 sm:$0xff]  }
  0x83   :  { %707 = vmatprep.subr.bf16.mxu0 %v1493_v7  ;;  %v1564_v7 = vld [vmem:[#allocation8 + $0x1f0] ss:$8 sps:$4 sm:$0xff]  }
  0x86   :  { %708 = vmatpush2.bf16.msra.mxu0 %v1491_v8  ;;  %v1569_v8 = vld [vmem:[#allocation8 + $0xe4] ss:$8 sps:$4 sm:$0xff]  }
  0x87   :  { %709 = vmatprep.subr.bf16.mxu0 %v1499_v9  ;;  %v1572_v9 = vld [vmem:[#allocation8 + $0x1e4] ss:$8 sps:$4 sm:$0xff]  }
  0x8a   :  { %710 = vmatpush2.bf16.msra.mxu0 %v1497_v10  ;;  %v1567_v10 = vld [vmem:[#allocation8 + $0xe0] ss:$8 sps:$4 sm:$0xff]  }
  0x8b   :  { %711 = vmatprep.subr.bf16.mxu0 %v1505_v12  ;;  %v1575_v12 = vld [vmem:[#allocation8 + $0xd4] ss:$8 sps:$4 sm:$0xff]  }
  0x8e   :  { %712 = vmatpush2.bf16.msra.mxu0 %v1503_v13  ;;  %v1578_v13 = vld [vmem:[#allocation8 + $0x1d4] ss:$8 sps:$4 sm:$0xff]  }
  0x8f   :  { %713 = vmatprep.subr.bf16.mxu0 %v1511_v16  ;;  %v1581_v16 = vld [vmem:[#allocation8 + $0xc4] ss:$8 sps:$4 sm:$0xff]  }
  0x92   :  { %714 = vmatpush2.bf16.msra.mxu0 %v1509_v17  ;;  %v1584_v17 = vld [vmem:[#allocation8 + $0x1c4] ss:$8 sps:$4 sm:$0xff]  }
  0x93   :  { %1169 = vmatprep.subr.bf16.mxu0 %v1518_v20  ;;  %v1587_v20 = vld [vmem:[#allocation8 + $0xb4] ss:$8 sps:$4 sm:$0xff]  }
 0x115   :  { %v225_v28 = vpop.f32.mrf.mxu0 }
 0x116   :  { %v226_v29 = vadd.f32 %v225_v28, %v104_v26  ;;  %v1588_v26 = vld [vmem:[#allocation8 + $0x1b0] ss:$8 sps:$4 sm:$0xff]   ;;  %v1596_v28 = vld [vmem:[#allocation8 + $0x1a4] ss:$8 sps:$4 sm:$0xff]  }
 0x117   :  { %v227_v30 = vpop.f32.mrf.mxu0 }
 0x118   :  { %v228_v31 = vadd.f32 %v227_v30, %v108_v27  ;;  %v232_v32 = vmax.f32 %v226_v29, 0.0  ;;  %v1593_v27 = vld [vmem:[#allocation8 + $0xa4] ss:$8 sps:$4 sm:$0xff]   ;;  %v1591_v29 = vld [vmem:[#allocation8 + $0xa0] ss:$8 sps:$4 sm:$0xff]  }
 0x119   :  { %v229_v33 = vpop.f32.mrf.mxu0  ;;  %v1594_v30 = vld [vmem:[#allocation8 + $0x1a0] ss:$8 sps:$4 sm:$0xff]  }
 0x11a   :  { %v233_v34 = vmax.f32 %v228_v31, 0.0  ;;  %v234_v39 = vpack.c.bf16 %v232_v32, %v232_v32  ;;  %v1599_v31 = vld [vmem:[#allocation8 + $0x94] ss:$8 sps:$4 sm:$0xff]   ;;  %v1597_v33 = vld [vmem:[#allocation8 + $0x90] ss:$8 sps:$4 sm:$0xff]  }
 0x11b   :  { %v230_v35 = vpop.f32.mrf.mxu0  ;;  %v1602_v32 = vld [vmem:[#allocation8 + $0x194] ss:$8 sps:$4 sm:$0xff]  }
 0x11c   :  { %v235_v36 = vpack.c.bf16 %v233_v34, %v233_v34  ;;  %v1600_v34 = vld [vmem:[#allocation8 + $0x190] ss:$8 sps:$4 sm:$0xff]   ;;  %v1605_v35 = vld [vmem:[#allocation8 + $0x84] ss:$8 sps:$4 sm:$0xff]  }
 0x11e   :  { %674 = vmatprep.mubr.bf16.mxu1 %v235_v36  ;;  %715 = vmatprep.mubr.bf16.mxu0 %v235_v36  ;;  %v1608_v36 = vld [vmem:[#allocation8 + $0x184] ss:$8 sps:$4 sm:$0xff]  }
 0x11f   :  { %675 = vmatmul.mubr.bf16.vlgmr.msra.gmra.mxu1 %v234_v39  ;;  %716 = vmatmul.mubr.bf16.vlgmr.msra.gmra.mxu0 %v234_v39  ;;  %v312_v39 = vsub.s32 2, %v1789_v22 }
 0x120   :  { %1129 = vmatpush1.bf16.msra.mxu1 %v1513_v37  ;;  %1170 = vmatpush1.bf16.msra.mxu0 %v1516_v38  ;;  %v1603_v37 = vld [vmem:[#allocation8 + $0x80] ss:$8 sps:$4 sm:$0xff]  }
 0x121   :  { %1130 = vmatprep.subr.bf16.mxu1 %v1521_v40  ;;  %1171 = vmatprep.subr.bf16.mxu0 %v1524_v41  ;;  %v1606_v38 = vld [vmem:[#allocation8 + $0x180] ss:$8 sps:$4 sm:$0xff]   ;;  %v300_v40 = vld [vmem:[%s1821_s4] sm:$0xf]  ;;  %v316_v41 = vsub.s32 3, %v1789_v22 }
 0x124   :  { %1131 = vmatpush1.bf16.msra.mxu1 %v1519_v42  ;;  %1172 = vmatpush1.bf16.msra.mxu0 %v1522_v43  ;;  %v305_v42 = vrot.slane %v300_v40, %v1792_v23  ;;  %v313_v43 = vrot.slane %v300_v40, %v312_v39 }
 0x125   :  { %1132 = vmatprep.subr.bf16.mxu1 %v1527_v44  ;;  %1173 = vmatprep.subr.bf16.mxu0 %v1530_v45  ;;  %v309_v44 = vrot.slane %v300_v40, %v1798_v25  ;;  %v317_v45 = vrot.slane %v300_v40, %v316_v41 }
 0x128   :  { %1133 = vmatpush1.bf16.msra.mxu1 %v1525_v46  ;;  %1174 = vmatpush1.bf16.msra.mxu0 %v1528_v47 }
 0x129   :  { %1134 = vmatprep.subr.bf16.mxu1 %v1533_v48  ;;  %1175 = vmatprep.subr.bf16.mxu0 %v1536_v49 }
 0x12c   :  { %1135 = vmatpush1.bf16.msra.mxu1 %v1531_v50  ;;  %1176 = vmatpush1.bf16.msra.mxu0 %v1534_v51 }
 0x12d   :  { %1136 = vmatprep.subr.bf16.mxu1 %v1539_v52  ;;  %1177 = vmatprep.subr.bf16.mxu0 %v1542_v53 }
 0x130   :  { %1137 = vmatpush1.bf16.msra.mxu1 %v1537_v54  ;;  %1178 = vmatpush1.bf16.msra.mxu0 %v1540_v55 }
 0x131   :  { %1138 = vmatprep.subr.bf16.mxu1 %v1545_v56  ;;  %1179 = vmatprep.subr.bf16.mxu0 %v1548_v57 }
 0x134   :  { %1139 = vmatpush1.bf16.msra.mxu1 %v1543_v58  ;;  %1180 = vmatpush1.bf16.msra.mxu0 %v1546_v59 }
 0x135   :  { %1140 = vmatprep.subr.bf16.mxu1 %v1551_v60  ;;  %1181 = vmatprep.subr.bf16.mxu0 %v1554_v61 }
 0x138   :  { %1141 = vmatpush1.bf16.msra.mxu1 %v1549_v62  ;;  %1182 = vmatpush1.bf16.msra.mxu0 %v1552_v63 }
 0x139   :  { %1142 = vmatprep.subr.bf16.mxu1 %v1557_v0  ;;  %1183 = vmatprep.subr.bf16.mxu0 %v1560_v1  ;;  %v796_v1 = vld [vmem:[%s1823_s6] sm:$0x3]  ;;  %s1730_s6 = smov [#allocation10]  }
 0x13a   :  { %s1227_s25 = sshll.u32 %s1730_s6, 4  ;;  %s1228_s25 = int_to_ptr.vmem [resolvable:$true] %s1227_s25 }
 0x13b   :  { %s1693_s26 = scalar_lea.vmem %s1228_s25, 128  ;;  %p1698_p7 = scmp.lt.s32.totalorder %s1228_s25, %s1228_s25 }
 0x13c   :  { %1143 = vmatpush1.bf16.msra.mxu1 %v1555_v2  ;;  %1184 = vmatpush1.bf16.msra.mxu0 %v1558_v3  ;;  %v801_v2 = vrot.slane %v796_v1, %v1792_v23  ;;  %v805_v3 = vrot.slane %v796_v1, %v1798_v25  ;;  %p1694_p6 = scmp.ne.s32.totalorder %s1228_s25, %s1693_s26  ;;  %p1699_p8 = scmp.lt.s32.totalorder %s1693_s26, %s1693_s26 }
 0x13d   :  { %1144 = vmatprep.subr.bf16.mxu1 %v1563_v4  ;;  %1185 = vmatprep.subr.bf16.mxu0 %v1566_v5 }
 0x13e   :  { %p1700_p9 = por %p1699_p8, %p1698_p7 }
 0x140   :  { %1145 = vmatpush2.bf16.msra.mxu1 %v1561_v6  ;;  %1186 = vmatpush2.bf16.msra.mxu0 %v1564_v7  ;;  %p1701_p10 = pnand %p1700_p9, %p1694_p6 }
 0x141   :  { %1146 = vmatprep.subr.bf16.mxu1 %v1569_v8  ;;  %1187 = vmatprep.subr.bf16.mxu0 %v1572_v9 }
 0x144   :  { %1147 = vmatpush2.bf16.msra.mxu1 %v1567_v10  ;;  %1188 = vmatpush2.bf16.msra.mxu0 %v1570_v11 }
 0x145   :  { %1148 = vmatprep.subr.bf16.mxu1 %v1575_v12  ;;  %1189 = vmatprep.subr.bf16.mxu0 %v1578_v13 }
 0x148   :  { %1149 = vmatpush2.bf16.msra.mxu1 %v1573_v14  ;;  %1190 = vmatpush2.bf16.msra.mxu0 %v1576_v15 }
 0x149   :  { %1150 = vmatprep.subr.bf16.mxu1 %v1581_v16  ;;  %1191 = vmatprep.subr.bf16.mxu0 %v1584_v17 }
 0x14c   :  { %1151 = vmatpush2.bf16.msra.mxu1 %v1579_v18  ;;  %1192 = vmatpush2.bf16.msra.mxu0 %v1582_v19 }
 0x14d   :  { %1152 = vmatprep.subr.bf16.mxu1 %v1587_v20  ;;  %1193 = vmatprep.subr.bf16.mxu0 %v1590_v21 }
 0x150   :  { %1153 = vmatpush2.bf16.msra.mxu1 %v1585_v24  ;;  %1194 = vmatpush2.bf16.msra.mxu0 %v1588_v26 }
 0x151   :  { %1154 = vmatprep.subr.bf16.mxu1 %v1593_v27  ;;  %1195 = vmatprep.subr.bf16.mxu0 %v1596_v28 }
 0x154   :  { %1155 = vmatpush2.bf16.msra.mxu1 %v1591_v29  ;;  %1196 = vmatpush2.bf16.msra.mxu0 %v1594_v30 }
 0x155   :  { %1156 = vmatprep.subr.bf16.mxu1 %v1599_v31  ;;  %1197 = vmatprep.subr.bf16.mxu0 %v1602_v32 }
 0x158   :  { %1157 = vmatpush2.bf16.msra.mxu1 %v1597_v33  ;;  %1198 = vmatpush2.bf16.msra.mxu0 %v1600_v34 }
 0x159   :  { %1158 = vmatprep.subr.bf16.mxu1 %v1605_v35  ;;  %1199 = vmatprep.subr.bf16.mxu0 %v1608_v36 }
 0x15c   :  { %1159 = vmatpush2.bf16.msra.mxu1 %v1603_v37  ;;  %1200 = vmatpush2.bf16.msra.mxu0 %v1606_v38 }
 0x1df   :  { %v676_v46 = vpop.f32.mrf.mxu1  ;;  %v717_v47 = vpop.f32.mrf.mxu0 }
 0x1e0   :  { %v677_v48 = vadd.f32 %v676_v46, %v305_v42  ;;  %v718_v49 = vadd.f32 %v717_v47, %v313_v43 }
 0x1e1   :  { %v678_v50 = vpop.f32.mrf.mxu1  ;;  %v719_v51 = vpop.f32.mrf.mxu0 }
 0x1e2   :  { %v679_v52 = vadd.f32 %v678_v50, %v309_v44  ;;  %v720_v53 = vadd.f32 %v719_v51, %v317_v45  ;;  %v724_v54 = vmax.f32 %v677_v48, 0.0  ;;  %v726_v55 = vmax.f32 %v718_v49, 0.0 }
 0x1e3   :  { %v680_v56 = vpop.f32.mrf.mxu1  ;;  %v721_v57 = vpop.f32.mrf.mxu0 }
 0x1e4   :  { %v725_v58 = vmax.f32 %v679_v52, 0.0  ;;  %v727_v22 = vmax.f32 %v720_v53, 0.0  ;;  %v728_v63 = vpack.c.bf16 %v724_v54, %v724_v54  ;;  %v730_v0 = vpack.c.bf16 %v726_v55, %v726_v55 }
 0x1e5   :  { %v681_v59 = vpop.f32.mrf.mxu1  ;;  %v722_v60 = vpop.f32.mrf.mxu0 }
 0x1e6   :  { %v729_v61 = vpack.c.bf16 %v725_v58, %v725_v58  ;;  %v731_v62 = vpack.c.bf16 %v727_v22, %v727_v22 }
 0x1e8   :  { %1160 = vmatprep.mubr.bf16.mxu1 %v729_v61  ;;  %1201 = vmatprep.mubr.bf16.mxu0 %v731_v62 }
 0x1e9   :  { %1161 = vmatmul.mubr.bf16.vlgmr.msra.gmra.mxu1 %v728_v63  ;;  %1202 = vmatmul.mubr.bf16.vlgmr.msra.gmra.mxu0 %v730_v0 }
 0x2a9   :  { %v1162_v4 = vpop.f32.mrf.mxu1  ;;  %v1203_v5 = vpop.f32.mrf.mxu0 }
 0x2aa   :  { %v1163_v6 = vadd.f32 %v1162_v4, %v801_v2 }
 0x2ab   :  { %v1164_v7 = vpop.f32.mrf.mxu1  ;;  %v1205_v8 = vpop.f32.mrf.mxu0 }
 0x2ac   :  { %v1204_v9 = vadd.f32 %v1203_v5, %v1163_v6  ;;  %v1165_v10 = vadd.f32 %v1164_v7, %v805_v3 }
 0x2ad   :  { %v1166_v11 = vpop.f32.mrf.mxu1  ;;  %v1207_v12 = vpop.f32.mrf.mxu0 }
 0x2ae   :  { %v1210_v13 = vpack.c.bf16 %v1204_v9, %v1204_v9  ;;  %v1206_v14 = vadd.f32 %v1205_v8, %v1165_v10 }
 0x2af   :  { %v1167_v15 = vpop.f32.mrf.mxu1  ;;  %v1208_v16 = vpop.f32.mrf.mxu0 }
 0x2b0   :  { %v1211_v17 = vpack.c.bf16 %v1206_v14, %v1206_v14  ;;  %1609 = vtanh.bf16 %v1210_v13 }
 0x2b2   :  { %1611 = vtanh.bf16 %v1211_v17 }
 0x2be   :  { %v1610_v23 = vpop.eup %1609 }
 0x2c0   :  { %v1612_v25 = vpop.eup %1611 }
 0x2c1   :  { %v1382_v18 = vcombine.low %v1610_v23, %v1612_v25 }
 0x2c3   :  { %1220 = vst [vmem:[#allocation10] sm:$0xff] %v1382_v18 }
 0x2c4   :  { %1704 = shalt.err (!%p1701_p10)
}
 0x2c5   :  { %1230 = dma.vmem_to_hbm [thread:$0]  %s1228_s25, 128, %s1824_s7, [#allocation4]  }
 0x2c6   :  { %1719 = dma.done.wait [#allocation4], 128  }
 0x2c7   :  { %1720 = vsyncadd [#allocation4], 4294967168 }
 0x2c8   :  { %1234 = vsyncpa [#allocation3], 1 }
 0x2c9   :  { %1235 = vsyncpa [#allocation6], 1 }
 0x2ca   :  { %1236 = vsyncpa [#allocation9], 1 }
 0x2cb   :  { %1237 = vsyncpa [#allocation4], 1 }

// kernel: tpu_custom_call.1
= control target key start
LH: loop header
LB: loop body
LE: loop exit
PB: predicated region body
PF: predicated region fallthrough
CT: control target
= control target key end

     0   :  { %12 = vsyncpa [#allocation3], 0  ;;  %s1817_s0 = inlined_call_operand.hbm [shape: f32[8,128], index: 0, kind: input, shape index: {}]   ;;  %s1818_s1 = inlined_call_operand.hbm [shape: bf16[128,256], index: 1, kind: input, shape index: {}]   ;;  %s1819_s2 = inlined_call_operand.vmem [shape: f32[1,256], index: 2, kind: input, shape index: {}]   ;;  %s1820_s3 = inlined_call_operand.hbm [shape: bf16[256,512], index: 3, kind: input, shape index: {}]   ;;  %s1821_s4 = inlined_call_operand.vmem [shape: f32[1,512], index: 4, kind: input, shape index: {}]   ;;  %s1822_s5 = inlined_call_operand.hbm [shape: bf16[512,256], index: 5, kind: input, shape index: {}]   ;;  %s1823_s6 = inlined_call_operand.vmem [shape: f32[1,256], index: 6, kind: input, shape index: {}]   ;;  %s1824_s7 = inlined_call_operand.hbm [shape: bf16[8,256], index: 7, kind: output, shape index: {}]  }
   0x1   :  { %13 = vsyncpa [#allocation6], 0 }
   0x2   :  { %14 = vsyncpa [#allocation9], 0 }
   0x3   :  { %15 = vsyncpa [#allocation4], 0  ;;  %s1721_s24 = smov [#allocation5]  }
   0x4   :  { %s31_s25 = sshll.u32 %s1721_s24, 4  ;;  %s32_s25 = int_to_ptr.vmem [resolvable:$true] %s31_s25 }
   0x5   :  { %s1621_s26 = scalar_lea.vmem %s32_s25, 2048  ;;  %p1626_p1 = scmp.lt.s32.totalorder %s32_s25, %s32_s25 }
   0x6   :  { %p1622_p0 = scmp.ne.s32.totalorder %s32_s25, %s1621_s26  ;;  %p1627_p2 = scmp.lt.s32.totalorder %s1621_s26, %s1621_s26 }
   0x8   :  { %p1628_p3 = por %p1627_p2, %p1626_p1 }
   0xa   :  { %p1629_p4 = pnand %p1628_p3, %p1622_p0 }
   0xc   :  { %1632 = shalt.err (!%p1629_p4)
}
   0xd   :  { %s1722_s27 = smov 128   ;;  %s1723_s28 = smov 8  }
   0xe   :  { %37 = dma.hbm_to_vmem [thread:$0]  %s1818_s1, 2048, %s32_s25, [#allocation6], %s1722_s27, %s1722_s27, %s1723_s28  }
   0xf   :  { %s1724_s8 = smov [#allocation2]   ;;  %s1725_s10 = smov [#allocation7]  }
  0x10   :  { %s22_s9 = sshll.u32 %s1724_s8, 4  ;;  %s45_s11 = sshll.u32 %s1725_s10, 4  ;;  %s23_s9 = int_to_ptr.vmem [resolvable:$true] %s22_s9  ;;  %s46_s11 = int_to_ptr.vmem [resolvable:$true] %s45_s11 }
  0x11   :  { %s1641_s12 = scalar_lea.vmem %s23_s9, 128  ;;  %p1646_p6 = scmp.lt.s32.totalorder %s23_s9, %s23_s9 }
  0x12   :  { %p1642_p5 = scmp.ne.s32.totalorder %s23_s9, %s1641_s12  ;;  %p1647_p7 = scmp.lt.s32.totalorder %s1641_s12, %s1641_s12 }
  0x14   :  { %p1648_p8 = por %p1647_p7, %p1646_p6 }
  0x16   :  { %p1649_p9 = pnand %p1648_p8, %p1642_p5 }
  0x18   :  { %1652 = shalt.err (!%p1649_p9)
}
  0x19   :  { %25 = dma.hbm_to_vmem [thread:$0]  %s1817_s0, 128, %s23_s9, [#allocation3]  }
  0x1a   :  { %s1661_s15 = scalar_lea.vmem %s46_s11, 8192  ;;  %p1666_p11 = scmp.lt.s32.totalorder %s46_s11, %s46_s11 }
  0x1b   :  { %p1662_p10 = scmp.ne.s32.totalorder %s46_s11, %s1661_s15  ;;  %p1667_p12 = scmp.lt.s32.totalorder %s1661_s15, %s1661_s15 }
  0x1d   :  { %p1668_p13 = por %p1667_p12, %p1666_p11 }
  0x1f   :  { %p1669_p0 = pnand %p1668_p13, %p1662_p10 }
  0x21   :  { %1672 = shalt.err (!%p1669_p0)
}
  0x22   :  { %s1726_s1 = smov 256   ;;  %s1727_s16 = smov 16  }
  0x23   :  { %51 = dma.hbm_to_vmem [thread:$0]  %s1820_s3, 8192, %s46_s11, [#allocation6], %s1726_s1, %s1726_s1, %s1727_s16  }
  0x24   :  { %s1728_s19 = smov [#allocation8]  }
  0x25   :  { %s59_s20 = sshll.u32 %s1728_s19, 4  ;;  %s60_s20 = int_to_ptr.vmem [resolvable:$true] %s59_s20 }
  0x26   :  { %s1681_s21 = scalar_lea.vmem %s60_s20, 8192  ;;  %p1686_p2 = scmp.lt.s32.totalorder %s60_s20, %s60_s20 }
  0x27   :  { %p1682_p1 = scmp.ne.s32.totalorder %s60_s20, %s1681_s21  ;;  %p1687_p3 = scmp.lt.s32.totalorder %s1681_s21, %s1681_s21 }
  0x29   :  { %p1688_p4 = por %p1687_p3, %p1686_p2 }
  0x2b   :  { %p1689_p5 = pnand %p1688_p4, %p1682_p1 }
  0x2d   :  { %1692 = shalt.err (!%p1689_p5)
}
  0x2e   :  { %65 = dma.hbm_to_vmem [thread:$0]  %s1822_s5, 8192, %s60_s20, [#allocation9], %s1722_s27, %s1722_s27, %s1723_s28  }
  0x2f   :  { %1713 = dma.done.wait [#allocation3], 128  }
  0x30   :  { %1714 = vsyncadd [#allocation3], 4294967168 }
  0x31   :  { %1715 = dma.done.wait [#allocation6], 10240  }
  0x32   :  { %1716 = vsyncadd [#allocation6], 4294957056 }
  0x33   :  { %1717 = dma.done.wait [#allocation9], 8192  }
  0x34   :  { %1718 = vsyncadd [#allocation9], 4294959104  ;;  %v1729_v0 = vmov 0   ;;  %v1393_v1 = vld [vmem:[#allocation5 + $0x74] ss:$8 sps:$4 sm:$0xff]  }
  0x35   :  { %223 = vmatprep.mubr.bf16.mxu0 %v1729_v0  ;;  %v1395_v2 = vld [vmem:[#allocation5 + $0x70] ss:$8 sps:$4 sm:$0xff]   ;;  %191 = vmatprep.subr.bf16.mxu0 %v1393_v1  ;;  %v1396_v3 = vld [vmem:[#allocation5 + $0x64] ss:$8 sps:$4 sm:$0xff]   ;;  %v1398_v4 = vld [vmem:[#allocation5 + $0x60] ss:$8 sps:$4 sm:$0xff]  }
  0x36   :  { %192 = vmatpush1.bf16.msra.mxu0 %v1395_v2  ;;  %v1399_v5 = vld [vmem:[#allocation5 + $0x54] ss:$8 sps:$4 sm:$0xff]   ;;  %v1401_v6 = vld [vmem:[#allocation5 + $0x50] ss:$8 sps:$4 sm:$0xff]   ;;  %v1402_v7 = vld [vmem:[#allocation5 + $0x44] ss:$8 sps:$4 sm:$0xff]  }
  0x37   :  { %193 = vmatprep.subr.bf16.mxu0 %v1396_v3  ;;  %v1404_v8 = vld [vmem:[#allocation5 + $0x40] ss:$8 sps:$4 sm:$0xff]   ;;  %v1417_v9 = vld [vmem:[#allocation7 + $0xe4] ss:$16 sps:$4 sm:$0xff]   ;;  %v1407_v13 = vld [vmem:[#allocation5 + $0x30] ss:$8 sps:$4 sm:$0xff]  }
  0x38   :  { %v1405_v10 = vld [vmem:[#allocation5 + $0x34] ss:$8 sps:$4 sm:$0xff]   ;;  %642 = vmatprep.subr.bf16.mxu1 %v1417_v9  ;;  %v1422_v11 = vld [vmem:[#allocation7 + $0xe0] ss:$16 sps:$4 sm:$0xff]   ;;  %v1408_v14 = vld [vmem:[#allocation5 + $0x24] ss:$8 sps:$4 sm:$0xff]  }
  0x39   :  { %v1423_v12 = vld [vmem:[#allocation7 + $0xc4] ss:$16 sps:$4 sm:$0xff]   ;;  %643 = vmatpush1.bf16.msra.mxu1 %v1422_v11  ;;  %v1428_v15 = vld [vmem:[#allocation7 + $0xc0] ss:$16 sps:$4 sm:$0xff]   ;;  %v81_v26 = vld [vmem:[#allocation2] sm:$0xff] }
  0x3a   :  { %194 = vmatpush1.bf16.msra.mxu0 %v1398_v4  ;;  %644 = vmatprep.subr.bf16.mxu1 %v1423_v12  ;;  %v1429_v16 = vld [vmem:[#allocation7 + $0xa4] ss:$16 sps:$4 sm:$0xff]   ;;  %v1410_v17 = vld [vmem:[#allocation5 + $0x20] ss:$8 sps:$4 sm:$0xff]   ;;  %v1413_v21 = vld [vmem:[#allocation5 + $0x10] ss:$8 sps:$4 sm:$0xff]   ;;  %v82_v30 = vpack.c.bf16 %v81_v26, %v81_v26 }
  0x3b   :  { %195 = vmatprep.subr.bf16.mxu0 %v1399_v5  ;;  %v1411_v18 = vld [vmem:[#allocation5 + $0x14] ss:$8 sps:$4 sm:$0xff]   ;;  %v1434_v19 = vld [vmem:[#allocation7 + $0xa0] ss:$16 sps:$4 sm:$0xff]   ;;  %v1414_v22 = vld [vmem:[#allocation5 + $0x4] ss:$8 sps:$4 sm:$0xff]  }
  0x3c   :  { %v1435_v20 = vld [vmem:[#allocation7 + $0x84] ss:$16 sps:$4 sm:$0xff]   ;;  %v1440_v23 = vld [vmem:[#allocation7 + $0x80] ss:$16 sps:$4 sm:$0xff]   ;;  %v1421_v27 = vld [vmem:[#allocation7 + $0xec] ss:$16 sps:$4 sm:$0xff]  }
  0x3d   :  { %645 = vmatpush1.bf16.msra.mxu1 %v1428_v15  ;;  %v1441_v24 = vld [vmem:[#allocation7 + $0x64] ss:$16 sps:$4 sm:$0xff]   ;;  %v1416_v25 = vld [vmem:[#allocation5] ss:$8 sps:$4 sm:$0xff]   ;;  %v1427_v32 = vld [vmem:[#allocation7 + $0xcc] ss:$16 sps:$4 sm:$0xff]  }
  0x3e   :  { %196 = vmatpush1.bf16.msra.mxu0 %v1401_v6  ;;  %646 = vmatprep.subr.bf16.mxu1 %v1429_v16  ;;  %v1446_v28 = vld [vmem:[#allocation7 + $0x60] ss:$16 sps:$4 sm:$0xff]   ;;  %v1447_v29 = vld [vmem:[#allocation7 + $0x44] ss:$16 sps:$4 sm:$0xff]   ;;  %v1419_v31 = vld [vmem:[#allocation7 + $0xe8] ss:$16 sps:$4 sm:$0xff]  }
  0x3f   :  { %197 = vmatprep.subr.bf16.mxu0 %v1402_v7  ;;  %v1452_v33 = vld [vmem:[#allocation7 + $0x40] ss:$16 sps:$4 sm:$0xff]   ;;  %v1453_v34 = vld [vmem:[#allocation7 + $0x24] ss:$16 sps:$4 sm:$0xff]   ;;  %v1425_v35 = vld [vmem:[#allocation7 + $0xc8] ss:$16 sps:$4 sm:$0xff]  }
  0x40   :  { %v1433_v36 = vld [vmem:[#allocation7 + $0xac] ss:$16 sps:$4 sm:$0xff]   ;;  %v1458_v37 = vld [vmem:[#allocation7 + $0x20] ss:$16 sps:$4 sm:$0xff]   ;;  %v1459_v38 = vld [vmem:[#allocation7 + $0x4] ss:$16 sps:$4 sm:$0xff]  }
  0x41   :  { %647 = vmatpush1.bf16.msra.mxu1 %v1434_v19  ;;  %v1431_v39 = vld [vmem:[#allocation7 + $0xa8] ss:$16 sps:$4 sm:$0xff]   ;;  %v1439_v40 = vld [vmem:[#allocation7 + $0x8c] ss:$16 sps:$4 sm:$0xff]   ;;  %v1464_v41 = vld [vmem:[#allocation7] ss:$16 sps:$4 sm:$0xff]  }
  0x42   :  { %198 = vmatpush1.bf16.msra.mxu0 %v1404_v8  ;;  %648 = vmatprep.subr.bf16.mxu1 %v1435_v20  ;;  %v1465_v42 = vld [vmem:[#allocation7 + $0x1e4] ss:$16 sps:$4 sm:$0xff]   ;;  %v1437_v43 = vld [vmem:[#allocation7 + $0x88] ss:$16 sps:$4 sm:$0xff]   ;;  %v1445_v44 = vld [vmem:[#allocation7 + $0x6c] ss:$16 sps:$4 sm:$0xff]  }
  0x43   :  { %199 = vmatprep.subr.bf16.mxu0 %v1405_v10  ;;  %v1470_v45 = vld [vmem:[#allocation7 + $0x1e0] ss:$16 sps:$4 sm:$0xff]   ;;  %v1471_v46 = vld [vmem:[#allocation7 + $0x1c4] ss:$16 sps:$4 sm:$0xff]   ;;  %v1443_v47 = vld [vmem:[#allocation7 + $0x68] ss:$16 sps:$4 sm:$0xff]  }
  0x44   :  { %v1476_v48 = vld [vmem:[#allocation7 + $0x1c0] ss:$16 sps:$4 sm:$0xff]   ;;  %v1451_v49 = vld [vmem:[#allocation7 + $0x4c] ss:$16 sps:$4 sm:$0xff]   ;;  %v1477_v50 = vld [vmem:[#allocation7 + $0x1a4] ss:$16 sps:$4 sm:$0xff]  }
  0x45   :  { %649 = vmatpush1.bf16.msra.mxu1 %v1440_v23  ;;  %v1449_v51 = vld [vmem:[#allocation7 + $0x48] ss:$16 sps:$4 sm:$0xff]   ;;  %v1482_v52 = vld [vmem:[#allocation7 + $0x1a0] ss:$16 sps:$4 sm:$0xff]   ;;  %v1457_v53 = vld [vmem:[#allocation7 + $0x2c] ss:$16 sps:$4 sm:$0xff]  }
  0x46   :  { %200 = vmatpush1.bf16.msra.mxu0 %v1407_v13  ;;  %650 = vmatprep.subr.bf16.mxu1 %v1441_v24  ;;  %v1483_v54 = vld [vmem:[#allocation7 + $0x184] ss:$16 sps:$4 sm:$0xff]   ;;  %v1455_v55 = vld [vmem:[#allocation7 + $0x28] ss:$16 sps:$4 sm:$0xff]   ;;  %v1488_v56 = vld [vmem:[#allocation7 + $0x180] ss:$16 sps:$4 sm:$0xff]  }
  0x47   :  { %201 = vmatprep.subr.bf16.mxu0 %v1408_v14  ;;  %v1463_v57 = vld [vmem:[#allocation7 + $0xc] ss:$16 sps:$4 sm:$0xff]   ;;  %v1489_v58 = vld [vmem:[#allocation7 + $0x164] ss:$16 sps:$4 sm:$0xff]   ;;  %v1461_v59 = vld [vmem:[#allocation7 + $0x8] ss:$16 sps:$4 sm:$0xff]  }
  0x48   :  { %v1494_v60 = vld [vmem:[#allocation7 + $0x160] ss:$16 sps:$4 sm:$0xff]   ;;  %v1469_v61 = vld [vmem:[#allocation7 + $0x1ec] ss:$16 sps:$4 sm:$0xff]   ;;  %v1495_v62 = vld [vmem:[#allocation7 + $0x144] ss:$16 sps:$4 sm:$0xff]  }
  0x49   :  { %651 = vmatpush1.bf16.msra.mxu1 %v1446_v28  ;;  %v1467_v63 = vld [vmem:[#allocation7 + $0x1e8] ss:$16 sps:$4 sm:$0xff]   ;;  %v1500_v0 = vld [vmem:[#allocation7 + $0x140] ss:$16 sps:$4 sm:$0xff]   ;;  %v1475_v1 = vld [vmem:[#allocation7 + $0x1cc] ss:$16 sps:$4 sm:$0xff]  }
  0x4a   :  { %202 = vmatpush1.bf16.msra.mxu0 %v1410_v17  ;;  %652 = vmatprep.subr.bf16.mxu1 %v1447_v29  ;;  %v1473_v2 = vld [vmem:[#allocation7 + $0x1c8] ss:$16 sps:$4 sm:$0xff]   ;;  %v1481_v3 = vld [vmem:[#allocation7 + $0x1ac] ss:$16 sps:$4 sm:$0xff]   ;;  %v1501_v11 = vld [vmem:[#allocation7 + $0x124] ss:$16 sps:$4 sm:$0xff]  }
  0x4b   :  { %203 = vmatprep.subr.bf16.mxu0 %v1411_v18  ;;  %v1479_v4 = vld [vmem:[#allocation7 + $0x1a8] ss:$16 sps:$4 sm:$0xff]   ;;  %v1487_v5 = vld [vmem:[#allocation7 + $0x18c] ss:$16 sps:$4 sm:$0xff]   ;;  %v1506_v14 = vld [vmem:[#allocation7 + $0x120] ss:$16 sps:$4 sm:$0xff]  }
  0x4c   :  { %v1485_v6 = vld [vmem:[#allocation7 + $0x188] ss:$16 sps:$4 sm:$0xff]   ;;  %v1493_v7 = vld [vmem:[#allocation7 + $0x16c] ss:$16 sps:$4 sm:$0xff]   ;;  %v1507_v15 = vld [vmem:[#allocation7 + $0x104] ss:$16 sps:$4 sm:$0xff]  }
  0x4d   :  { %653 = vmatpush1.bf16.msra.mxu1 %v1452_v33  ;;  %v1491_v8 = vld [vmem:[#allocation7 + $0x168] ss:$16 sps:$4 sm:$0xff]   ;;  %v1499_v9 = vld [vmem:[#allocation7 + $0x14c] ss:$16 sps:$4 sm:$0xff]   ;;  %v1512_v18 = vld [vmem:[#allocation7 + $0x100] ss:$16 sps:$4 sm:$0xff]  }
  0x4e   :  { %204 = vmatpush1.bf16.msra.mxu0 %v1413_v21  ;;  %654 = vmatprep.subr.bf16.mxu1 %v1453_v34  ;;  %v1497_v10 = vld [vmem:[#allocation7 + $0x148] ss:$16 sps:$4 sm:$0xff]   ;;  %v1505_v12 = vld [vmem:[#allocation7 + $0x12c] ss:$16 sps:$4 sm:$0xff]   ;;  %v101_v21 = vlaneseq }
  0x4f   :  { %205 = vmatprep.subr.bf16.mxu0 %v1414_v22  ;;  %v1503_v13 = vld [vmem:[#allocation7 + $0x128] ss:$16 sps:$4 sm:$0xff]   ;;  %v1511_v16 = vld [vmem:[#allocation7 + $0x10c] ss:$16 sps:$4 sm:$0xff]  }
  0x50   :  { %v1509_v17 = vld [vmem:[#allocation7 + $0x108] ss:$16 sps:$4 sm:$0xff]   ;;  %v1515_v19 = vld [vmem:[#allocation8 + $0x74] ss:$8 sps:$4 sm:$0xff]   ;;  %v1789_v22 = vshrl.u32 %v101_v21, 7 }
  0x51   :  { %655 = vmatpush1.bf16.msra.mxu1 %v1458_v37  ;;  %v1518_v20 = vld [vmem:[#allocation8 + $0x174] ss:$8 sps:$4 sm:$0xff]   ;;  %v99_v24 = vld [vmem:[%s1819_s2] sm:$0x3] }
  0x52   :  { %206 = vmatpush1.bf16.msra.mxu0 %v1416_v25  ;;  %656 = vmatprep.subr.bf16.mxu1 %v1459_v38  ;;  %v1792_v23 = vsub.s32 0, %v1789_v22  ;;  %v1798_v25 = vsub.s32 1, %v1789_v22  ;;  %v1513_v37 = vld [vmem:[#allocation8 + $0x70] ss:$8 sps:$4 sm:$0xff]   ;;  %v1590_v21 = vld [vmem:[#allocation8 + $0x1b4] ss:$8 sps:$4 sm:$0xff]  }
  0x53   :  { %683 = vmatprep.subr.bf16.mxu0 %v1421_v27  ;;  %v1516_v38 = vld [vmem:[#allocation8 + $0x170] ss:$8 sps:$4 sm:$0xff]  }
  0x54   :  { %v104_v26 = vrot.slane %v99_v24, %v1792_v23  ;;  %v108_v27 = vrot.slane %v99_v24, %v1798_v25  ;;  %v1585_v24 = vld [vmem:[#allocation8 + $0xb0] ss:$8 sps:$4 sm:$0xff]  }
  0x55   :  { %224 = vmatmul.mubr.bf16.vlgmr.msra.gmra.mxu0 %v82_v30  ;;  %657 = vmatpush1.bf16.msra.mxu1 %v1464_v41  ;;  %v1524_v41 = vld [vmem:[#allocation8 + $0x164] ss:$8 sps:$4 sm:$0xff]  }
  0x56   :  { %684 = vmatpush1.bf16.msra.mxu0 %v1419_v31  ;;  %658 = vmatprep.subr.bf16.mxu1 %v1465_v42  ;;  %v1519_v42 = vld [vmem:[#allocation8 + $0x60] ss:$8 sps:$4 sm:$0xff]  }
  0x57   :  { %685 = vmatprep.subr.bf16.mxu0 %v1427_v32 }
  0x59   :  { %659 = vmatpush2.bf16.msra.mxu1 %v1470_v45  ;;  %v1530_v45 = vld [vmem:[#allocation8 + $0x154] ss:$8 sps:$4 sm:$0xff]  }
  0x5a   :  { %686 = vmatpush1.bf16.msra.mxu0 %v1425_v35  ;;  %660 = vmatprep.subr.bf16.mxu1 %v1471_v46  ;;  %v1525_v46 = vld [vmem:[#allocation8 + $0x50] ss:$8 sps:$4 sm:$0xff]  }
  0x5b   :  { %687 = vmatprep.subr.bf16.mxu0 %v1433_v36 }
  0x5d   :  { %661 = vmatpush2.bf16.msra.mxu1 %v1476_v48  ;;  %v1533_v48 = vld [vmem:[#allocation8 + $0x44] ss:$8 sps:$4 sm:$0xff]  }
  0x5e   :  { %688 = vmatpush1.bf16.msra.mxu0 %v1431_v39  ;;  %662 = vmatprep.subr.bf16.mxu1 %v1477_v50  ;;  %v1531_v50 = vld [vmem:[#allocation8 + $0x40] ss:$8 sps:$4 sm:$0xff]  }
  0x5f   :  { %689 = vmatprep.subr.bf16.mxu0 %v1439_v40  ;;  %v1521_v40 = vld [vmem:[#allocation8 + $0x64] ss:$8 sps:$4 sm:$0xff]  }
  0x61   :  { %663 = vmatpush2.bf16.msra.mxu1 %v1482_v52  ;;  %v1539_v52 = vld [vmem:[#allocation8 + $0x34] ss:$8 sps:$4 sm:$0xff]  }
  0x62   :  { %690 = vmatpush1.bf16.msra.mxu0 %v1437_v43  ;;  %664 = vmatprep.subr.bf16.mxu1 %v1483_v54  ;;  %v1522_v43 = vld [vmem:[#allocation8 + $0x160] ss:$8 sps:$4 sm:$0xff]   ;;  %v1537_v54 = vld [vmem:[#allocation8 + $0x30] ss:$8 sps:$4 sm:$0xff]  }
  0x63   :  { %691 = vmatprep.subr.bf16.mxu0 %v1445_v44  ;;  %v1527_v44 = vld [vmem:[#allocation8 + $0x54] ss:$8 sps:$4 sm:$0xff]  }
  0x65   :  { %665 = vmatpush2.bf16.msra.mxu1 %v1488_v56  ;;  %v1545_v56 = vld [vmem:[#allocation8 + $0x24] ss:$8 sps:$4 sm:$0xff]  }
  0x66   :  { %692 = vmatpush1.bf16.msra.mxu0 %v1443_v47  ;;  %666 = vmatprep.subr.bf16.mxu1 %v1489_v58  ;;  %v1528_v47 = vld [vmem:[#allocation8 + $0x150] ss:$8 sps:$4 sm:$0xff]   ;;  %v1543_v58 = vld [vmem:[#allocation8 + $0x20] ss:$8 sps:$4 sm:$0xff]  }
  0x67   :  { %693 = vmatprep.subr.bf16.mxu0 %v1451_v49  ;;  %v1536_v49 = vld [vmem:[#allocation8 + $0x144] ss:$8 sps:$4 sm:$0xff]  }
  0x69   :  { %667 = vmatpush2.bf16.msra.mxu1 %v1494_v60  ;;  %v1551_v60 = vld [vmem:[#allocation8 + $0x14] ss:$8 sps:$4 sm:$0xff]  }
  0x6a   :  { %694 = vmatpush1.bf16.msra.mxu0 %v1449_v51  ;;  %668 = vmatprep.subr.bf16.mxu1 %v1495_v62  ;;  %v1534_v51 = vld [vmem:[#allocation8 + $0x140] ss:$8 sps:$4 sm:$0xff]   ;;  %v1549_v62 = vld [vmem:[#allocation8 + $0x10] ss:$8 sps:$4 sm:$0xff]  }
  0x6b   :  { %695 = vmatprep.subr.bf16.mxu0 %v1457_v53  ;;  %v1542_v53 = vld [vmem:[#allocation8 + $0x134] ss:$8 sps:$4 sm:$0xff]  }
  0x6d   :  { %669 = vmatpush2.bf16.msra.mxu1 %v1500_v0  ;;  %v1557_v0 = vld [vmem:[#allocation8 + $0x4] ss:$8 sps:$4 sm:$0xff]  }
  0x6e   :  { %696 = vmatpush1.bf16.msra.mxu0 %v1455_v55  ;;  %670 = vmatprep.subr.bf16.mxu1 %v1501_v11  ;;  %v1540_v55 = vld [vmem:[#allocation8 + $0x130] ss:$8 sps:$4 sm:$0xff]   ;;  %v1570_v11 = vld [vmem:[#allocation8 + $0x1e0] ss:$8 sps:$4 sm:$0xff]  }
  0x6f   :  { %697 = vmatprep.subr.bf16.mxu0 %v1463_v57  ;;  %v1548_v57 = vld [vmem:[#allocation8 + $0x124] ss:$8 sps:$4 sm:$0xff]  }
  0x71   :  { %671 = vmatpush2.bf16.msra.mxu1 %v1506_v14  ;;  %v1573_v14 = vld [vmem:[#allocation8 + $0xd0] ss:$8 sps:$4 sm:$0xff]  }
  0x72   :  { %698 = vmatpush1.bf16.msra.mxu0 %v1461_v59  ;;  %672 = vmatprep.subr.bf16.mxu1 %v1507_v15  ;;  %v1546_v59 = vld [vmem:[#allocation8 + $0x120] ss:$8 sps:$4 sm:$0xff]   ;;  %v1576_v15 = vld [vmem:[#allocation8 + $0x1d0] ss:$8 sps:$4 sm:$0xff]  }
  0x73   :  { %699 = vmatprep.subr.bf16.mxu0 %v1469_v61  ;;  %v1554_v61 = vld [vmem:[#allocation8 + $0x114] ss:$8 sps:$4 sm:$0xff]  }
  0x75   :  { %673 = vmatpush2.bf16.msra.mxu1 %v1512_v18  ;;  %v1579_v18 = vld [vmem:[#allocation8 + $0xc0] ss:$8 sps:$4 sm:$0xff]  }
  0x76   :  { %700 = vmatpush2.bf16.msra.mxu0 %v1467_v63  ;;  %1128 = vmatprep.subr.bf16.mxu1 %v1515_v19  ;;  %v1552_v63 = vld [vmem:[#allocation8 + $0x110] ss:$8 sps:$4 sm:$0xff]   ;;  %v1582_v19 = vld [vmem:[#allocation8 + $0x1c0] ss:$8 sps:$4 sm:$0xff]  }
  0x77   :  { %701 = vmatprep.subr.bf16.mxu0 %v1475_v1  ;;  %v1560_v1 = vld [vmem:[#allocation8 + $0x104] ss:$8 sps:$4 sm:$0xff]  }
  0x7a   :  { %702 = vmatpush2.bf16.msra.mxu0 %v1473_v2  ;;  %v1555_v2 = vld [vmem:[#allocation8] ss:$8 sps:$4 sm:$0xff]  }
  0x7b   :  { %703 = vmatprep.subr.bf16.mxu0 %v1481_v3  ;;  %v1558_v3 = vld [vmem:[#allocation8 + $0x100] ss:$8 sps:$4 sm:$0xff]  }
  0x7e   :  { %704 = vmatpush2.bf16.msra.mxu0 %v1479_v4  ;;  %v1563_v4 = vld [vmem:[#allocation8 + $0xf4] ss:$8 sps:$4 sm:$0xff]  }
  0x7f   :  { %705 = vmatprep.subr.bf16.mxu0 %v1487_v5  ;;  %v1566_v5 = vld [vmem:[#allocation8 + $0x1f4] ss:$8 sps:$4 sm:$0xff]  }
  0x82   :  { %706 = vmatpush2.bf16.msra.mxu0 %v1485_v6  ;;  %v1561_v6 = vld [vmem:[#allocation8 + $0xf0] ss:$8 sps:$4 sm:$0xff]  }
  0x83   :  { %707 = vmatprep.subr.bf16.mxu0 %v1493_v7  ;;  %v1564_v7 = vld [vmem:[#allocation8 + $0x1f0] ss:$8 sps:$4 sm:$0xff]  }
  0x86   :  { %708 = vmatpush2.bf16.msra.mxu0 %v1491_v8  ;;  %v1569_v8 = vld [vmem:[#allocation8 + $0xe4] ss:$8 sps:$4 sm:$0xff]  }
  0x87   :  { %709 = vmatprep.subr.bf16.mxu0 %v1499_v9  ;;  %v1572_v9 = vld [vmem:[#allocation8 + $0x1e4] ss:$8 sps:$4 sm:$0xff]  }
  0x8a   :  { %710 = vmatpush2.bf16.msra.mxu0 %v1497_v10  ;;  %v1567_v10 = vld [vmem:[#allocation8 + $0xe0] ss:$8 sps:$4 sm:$0xff]  }
  0x8b   :  { %711 = vmatprep.subr.bf16.mxu0 %v1505_v12  ;;  %v1575_v12 = vld [vmem:[#allocation8 + $0xd4] ss:$8 sps:$4 sm:$0xff]  }
  0x8e   :  { %712 = vmatpush2.bf16.msra.mxu0 %v1503_v13  ;;  %v1578_v13 = vld [vmem:[#allocation8 + $0x1d4] ss:$8 sps:$4 sm:$0xff]  }
  0x8f   :  { %713 = vmatprep.subr.bf16.mxu0 %v1511_v16  ;;  %v1581_v16 = vld [vmem:[#allocation8 + $0xc4] ss:$8 sps:$4 sm:$0xff]  }
  0x92   :  { %714 = vmatpush2.bf16.msra.mxu0 %v1509_v17  ;;  %v1584_v17 = vld [vmem:[#allocation8 + $0x1c4] ss:$8 sps:$4 sm:$0xff]  }
  0x93   :  { %1169 = vmatprep.subr.bf16.mxu0 %v1518_v20  ;;  %v1587_v20 = vld [vmem:[#allocation8 + $0xb4] ss:$8 sps:$4 sm:$0xff]  }
 0x115   :  { %v225_v28 = vpop.f32.mrf.mxu0 }
 0x116   :  { %v226_v29 = vadd.f32 %v225_v28, %v104_v26  ;;  %v1588_v26 = vld [vmem:[#allocation8 + $0x1b0] ss:$8 sps:$4 sm:$0xff]   ;;  %v1596_v28 = vld [vmem:[#allocation8 + $0x1a4] ss:$8 sps:$4 sm:$0xff]  }
 0x117   :  { %v227_v30 = vpop.f32.mrf.mxu0 }
 0x118   :  { %v228_v31 = vadd.f32 %v227_v30, %v108_v27  ;;  %v232_v32 = vmax.f32 %v226_v29, 0.0  ;;  %v1593_v27 = vld [vmem:[#allocation8 + $0xa4] ss:$8 sps:$4 sm:$0xff]   ;;  %v1591_v29 = vld [vmem:[#allocation8 + $0xa0] ss:$8 sps:$4 sm:$0xff]  }
 0x119   :  { %v229_v33 = vpop.f32.mrf.mxu0  ;;  %v1594_v30 = vld [vmem:[#allocation8 + $0x1a0] ss:$8 sps:$4 sm:$0xff]  }
 0x11a   :  { %v233_v34 = vmax.f32 %v228_v31, 0.0  ;;  %v234_v39 = vpack.c.bf16 %v232_v32, %v232_v32  ;;  %v1599_v31 = vld [vmem:[#allocation8 + $0x94] ss:$8 sps:$4 sm:$0xff]   ;;  %v1597_v33 = vld [vmem:[#allocation8 + $0x90] ss:$8 sps:$4 sm:$0xff]  }
 0x11b   :  { %v230_v35 = vpop.f32.mrf.mxu0  ;;  %v1602_v32 = vld [vmem:[#allocation8 + $0x194] ss:$8 sps:$4 sm:$0xff]  }
 0x11c   :  { %v235_v36 = vpack.c.bf16 %v233_v34, %v233_v34  ;;  %v1600_v34 = vld [vmem:[#allocation8 + $0x190] ss:$8 sps:$4 sm:$0xff]   ;;  %v1605_v35 = vld [vmem:[#allocation8 + $0x84] ss:$8 sps:$4 sm:$0xff]  }
 0x11e   :  { %674 = vmatprep.mubr.bf16.mxu1 %v235_v36  ;;  %715 = vmatprep.mubr.bf16.mxu0 %v235_v36  ;;  %v1608_v36 = vld [vmem:[#allocation8 + $0x184] ss:$8 sps:$4 sm:$0xff]  }
 0x11f   :  { %675 = vmatmul.mubr.bf16.vlgmr.msra.gmra.mxu1 %v234_v39  ;;  %716 = vmatmul.mubr.bf16.vlgmr.msra.gmra.mxu0 %v234_v39  ;;  %v312_v39 = vsub.s32 2, %v1789_v22 }
 0x120   :  { %1129 = vmatpush1.bf16.msra.mxu1 %v1513_v37  ;;  %1170 = vmatpush1.bf16.msra.mxu0 %v1516_v38  ;;  %v1603_v37 = vld [vmem:[#allocation8 + $0x80] ss:$8 sps:$4 sm:$0xff]  }
 0x121   :  { %1130 = vmatprep.subr.bf16.mxu1 %v1521_v40  ;;  %1171 = vmatprep.subr.bf16.mxu0 %v1524_v41  ;;  %v1606_v38 = vld [vmem:[#allocation8 + $0x180] ss:$8 sps:$4 sm:$0xff]   ;;  %v300_v40 = vld [vmem:[%s1821_s4] sm:$0xf]  ;;  %v316_v41 = vsub.s32 3, %v1789_v22 }
 0x124   :  { %1131 = vmatpush1.bf16.msra.mxu1 %v1519_v42  ;;  %1172 = vmatpush1.bf16.msra.mxu0 %v1522_v43  ;;  %v305_v42 = vrot.slane %v300_v40, %v1792_v23  ;;  %v313_v43 = vrot.slane %v300_v40, %v312_v39 }
 0x125   :  { %1132 = vmatprep.subr.bf16.mxu1 %v1527_v44  ;;  %1173 = vmatprep.subr.bf16.mxu0 %v1530_v45  ;;  %v309_v44 = vrot.slane %v300_v40, %v1798_v25  ;;  %v317_v45 = vrot.slane %v300_v40, %v316_v41 }
 0x128   :  { %1133 = vmatpush1.bf16.msra.mxu1 %v1525_v46  ;;  %1174 = vmatpush1.bf16.msra.mxu0 %v1528_v47 }
 0x129   :  { %1134 = vmatprep.subr.bf16.mxu1 %v1533_v48  ;;  %1175 = vmatprep.subr.bf16.mxu0 %v1536_v49 }
 0x12c   :  { %1135 = vmatpush1.bf16.msra.mxu1 %v1531_v50  ;;  %1176 = vmatpush1.bf16.msra.mxu0 %v1534_v51 }
 0x12d   :  { %1136 = vmatprep.subr.bf16.mxu1 %v1539_v52  ;;  %1177 = vmatprep.subr.bf16.mxu0 %v1542_v53 }
 0x130   :  { %1137 = vmatpush1.bf16.msra.mxu1 %v1537_v54  ;;  %1178 = vmatpush1.bf16.msra.mxu0 %v1540_v55 }
 0x131   :  { %1138 = vmatprep.subr.bf16.mxu1 %v1545_v56  ;;  %1179 = vmatprep.subr.bf16.mxu0 %v1548_v57 }
 0x134   :  { %1139 = vmatpush1.bf16.msra.mxu1 %v1543_v58  ;;  %1180 = vmatpush1.bf16.msra.mxu0 %v1546_v59 }
 0x135   :  { %1140 = vmatprep.subr.bf16.mxu1 %v1551_v60  ;;  %1181 = vmatprep.subr.bf16.mxu0 %v1554_v61 }
 0x138   :  { %1141 = vmatpush1.bf16.msra.mxu1 %v1549_v62  ;;  %1182 = vmatpush1.bf16.msra.mxu0 %v1552_v63 }
 0x139   :  { %1142 = vmatprep.subr.bf16.mxu1 %v1557_v0  ;;  %1183 = vmatprep.subr.bf16.mxu0 %v1560_v1  ;;  %v796_v1 = vld [vmem:[%s1823_s6] sm:$0x3]  ;;  %s1730_s6 = smov [#allocation10]  }
 0x13a   :  { %s1227_s25 = sshll.u32 %s1730_s6, 4  ;;  %s1228_s25 = int_to_ptr.vmem [resolvable:$true] %s1227_s25 }
 0x13b   :  { %s1693_s26 = scalar_lea.vmem %s1228_s25, 128  ;;  %p1698_p7 = scmp.lt.s32.totalorder %s1228_s25, %s1228_s25 }
 0x13c   :  { %1143 = vmatpush1.bf16.msra.mxu1 %v1555_v2  ;;  %1184 = vmatpush1.bf16.msra.mxu0 %v1558_v3  ;;  %v801_v2 = vrot.slane %v796_v1, %v1792_v23  ;;  %v805_v3 = vrot.slane %v796_v1, %v1798_v25  ;;  %p1694_p6 = scmp.ne.s32.totalorder %s1228_s25, %s1693_s26  ;;  %p1699_p8 = scmp.lt.s32.totalorder %s1693_s26, %s1693_s26 }
 0x13d   :  { %1144 = vmatprep.subr.bf16.mxu1 %v1563_v4  ;;  %1185 = vmatprep.subr.bf16.mxu0 %v1566_v5 }
 0x13e   :  { %p1700_p9 = por %p1699_p8, %p1698_p7 }
 0x140   :  { %1145 = vmatpush2.bf16.msra.mxu1 %v1561_v6  ;;  %1186 = vmatpush2.bf16.msra.mxu0 %v1564_v7  ;;  %p1701_p10 = pnand %p1700_p9, %p1694_p6 }
 0x141   :  { %1146 = vmatprep.subr.bf16.mxu1 %v1569_v8  ;;  %1187 = vmatprep.subr.bf16.mxu0 %v1572_v9 }
 0x144   :  { %1147 = vmatpush2.bf16.msra.mxu1 %v1567_v10  ;;  %1188 = vmatpush2.bf16.msra.mxu0 %v1570_v11 }
 0x145   :  { %1148 = vmatprep.subr.bf16.mxu1 %v1575_v12  ;;  %1189 = vmatprep.subr.bf16.mxu0 %v1578_v13 }
 0x148   :  { %1149 = vmatpush2.bf16.msra.mxu1 %v1573_v14  ;;  %1190 = vmatpush2.bf16.msra.mxu0 %v1576_v15 }
 0x149   :  { %1150 = vmatprep.subr.bf16.mxu1 %v1581_v16  ;;  %1191 = vmatprep.subr.bf16.mxu0 %v1584_v17 }
 0x14c   :  { %1151 = vmatpush2.bf16.msra.mxu1 %v1579_v18  ;;  %1192 = vmatpush2.bf16.msra.mxu0 %v1582_v19 }
 0x14d   :  { %1152 = vmatprep.subr.bf16.mxu1 %v1587_v20  ;;  %1193 = vmatprep.subr.bf16.mxu0 %v1590_v21 }
 0x150   :  { %1153 = vmatpush2.bf16.msra.mxu1 %v1585_v24  ;;  %1194 = vmatpush2.bf16.msra.mxu0 %v1588_v26 }
 0x151   :  { %1154 = vmatprep.subr.bf16.mxu1 %v1593_v27  ;;  %1195 = vmatprep.subr.bf16.mxu0 %v1596_v28 }
 0x154   :  { %1155 = vmatpush2.bf16.msra.mxu1 %v1591_v29  ;;  %1196 = vmatpush2.bf16.msra.mxu0 %v1594_v30 }
 0x155   :  { %1156 = vmatprep.subr.bf16.mxu1 %v1599_v31  ;;  %1197 = vmatprep.subr.bf16.mxu0 %v1602_v32 }
 0x158   :  { %1157 = vmatpush2.bf16.msra.mxu1 %v1597_v33  ;;  %1198 = vmatpush2.bf16.msra.mxu0 %v1600_v34 }
 0x159   :  { %1158 = vmatprep.subr.bf16.mxu1 %v1605_v35  ;;  %1199 = vmatprep.subr.bf16.mxu0 %v1608_v36 }
 0x15c   :  { %1159 = vmatpush2.bf16.msra.mxu1 %v1603_v37  ;;  %1200 = vmatpush2.bf16.msra.mxu0 %v1606_v38 }
 0x1df   :  { %v676_v46 = vpop.f32.mrf.mxu1  ;;  %v717_v47 = vpop.f32.mrf.mxu0 }
 0x1e0   :  { %v677_v48 = vadd.f32 %v676_v46, %v305_v42  ;;  %v718_v49 = vadd.f32 %v717_v47, %v313_v43 }
 0x1e1   :  { %v678_v50 = vpop.f32.mrf.mxu1  ;;  %v719_v51 = vpop.f32.mrf.mxu0 }
 0x1e2   :  { %v679_v52 = vadd.f32 %v678_v50, %v309_v44  ;;  %v720_v53 = vadd.f32 %v719_v51, %v317_v45  ;;  %v724_v54 = vmax.f32 %v677_v48, 0.0  ;;  %v726_v55 = vmax.f32 %v718_v49, 0.0 }
 0x1e3   :  { %v680_v56 = vpop.f32.mrf.mxu1  ;;  %v721_v57 = vpop.f32.mrf.mxu0 }
 0x1e4   :  { %v725_v58 = vmax.f32 %v679_v52, 0.0  ;;  %v727_v22 = vmax.f32 %v720_v53, 0.0  ;;  %v728_v63 = vpack.c.bf16 %v724_v54, %v724_v54  ;;  %v730_v0 = vpack.c.bf16 %v726_v55, %v726_v55 }
 0x1e5   :  { %v681_v59 = vpop.f32.mrf.mxu1  ;;  %v722_v60 = vpop.f32.mrf.mxu0 }
 0x1e6   :  { %v729_v61 = vpack.c.bf16 %v725_v58, %v725_v58  ;;  %v731_v62 = vpack.c.bf16 %v727_v22, %v727_v22 }
 0x1e8   :  { %1160 = vmatprep.mubr.bf16.mxu1 %v729_v61  ;;  %1201 = vmatprep.mubr.bf16.mxu0 %v731_v62 }
 0x1e9   :  { %1161 = vmatmul.mubr.bf16.vlgmr.msra.gmra.mxu1 %v728_v63  ;;  %1202 = vmatmul.mubr.bf16.vlgmr.msra.gmra.mxu0 %v730_v0 }
 0x2a9   :  { %v1162_v4 = vpop.f32.mrf.mxu1  ;;  %v1203_v5 = vpop.f32.mrf.mxu0 }
 0x2aa   :  { %v1163_v6 = vadd.f32 %v1162_v4, %v801_v2 }
 0x2ab   :  { %v1164_v7 = vpop.f32.mrf.mxu1  ;;  %v1205_v8 = vpop.f32.mrf.mxu0 }
 0x2ac   :  { %v1204_v9 = vadd.f32 %v1203_v5, %v1163_v6  ;;  %v1165_v10 = vadd.f32 %v1164_v7, %v805_v3 }
 0x2ad   :  { %v1166_v11 = vpop.f32.mrf.mxu1  ;;  %v1207_v12 = vpop.f32.mrf.mxu0 }
 0x2ae   :  { %v1210_v13 = vpack.c.bf16 %v1204_v9, %v1204_v9  ;;  %v1206_v14 = vadd.f32 %v1205_v8, %v1165_v10 }
 0x2af   :  { %v1167_v15 = vpop.f32.mrf.mxu1  ;;  %v1208_v16 = vpop.f32.mrf.mxu0 }
 0x2b0   :  { %v1211_v17 = vpack.c.bf16 %v1206_v14, %v1206_v14  ;;  %1609 = vtanh.bf16 %v1210_v13 }
 0x2b2   :  { %1611 = vtanh.bf16 %v1211_v17 }
 0x2be   :  { %v1610_v23 = vpop.eup %1609 }
 0x2c0   :  { %v1612_v25 = vpop.eup %1611 }
 0x2c1   :  { %v1382_v18 = vcombine.low %v1610_v23, %v1612_v25 }
 0x2c3   :  { %1220 = vst [vmem:[#allocation10] sm:$0xff] %v1382_v18 }
 0x2c4   :  { %1704 = shalt.err (!%p1701_p10)
}
 0x2c5   :  { %1230 = dma.vmem_to_hbm [thread:$0]  %s1228_s25, 128, %s1824_s7, [#allocation4]  }
 0x2c6   :  { %1719 = dma.done.wait [#allocation4], 128  }
 0x2c7   :  { %1720 = vsyncadd [#allocation4], 4294967168 }
 0x2c8   :  { %1234 = vsyncpa [#allocation3], 1 }
 0x2c9   :  { %1235 = vsyncpa [#allocation6], 1 }
 0x2ca   :  { %1236 = vsyncpa [#allocation9], 1 }
 0x2cb   :  { %1237 = vsyncpa [#allocation4], 1 }

</bundles_post_ra>
